<compile_context>
chip_gen: v6e
topology: v6e:2x2x1
jax: 0.10.0
libtpu: 0.0.40
codegen_flags: <defaults>
</compile_context>

<pallas_src>
import jax
import jax.numpy as jnp
import numpy as np
from jax.experimental import pallas as pl
from jax.experimental.pallas import tpu as pltpu


# ----------------------------------------------------------------------------
# Weight-only preprocessing (tiny tensors, runs in the wrapper / under jit).
# ----------------------------------------------------------------------------
def _conv_toeplitz(w, w_in):
    """w: (kh, kw, Cin, Cout) HWIO conv weight -> (kh, w_in*Cin, OW*Cout).

    T[dy, wx*Cin + ci, ox*Cout + co] = w[dy, wx-ox, ci, co] if 0 <= wx-ox < kw
    so that for a feature map stored as 2D rows of width w_in*Cin
    (lane index = wx*Cin + ci) the valid 3x3 conv is
        out2d = sum_dy  x2d[dy:dy+OH, :] @ T[dy]          (pure 2D MXU matmuls)
    """
    kh, kw, cin, cout = w.shape
    ow = w_in - kw + 1
    wx = np.arange(w_in)[:, None]
    ox = np.arange(ow)[None, :]
    dx = wx - ox                                        # (w_in, ow)
    valid = jnp.asarray((dx >= 0) & (dx < kw), jnp.float32)[..., None, None]
    dxc = np.clip(dx, 0, kw - 1)
    mats = []
    for dy in range(kh):
        blk = w[dy][dxc] * valid                        # (w_in, ow, cin, cout)
        mats.append(jnp.transpose(blk, (0, 2, 1, 3)).reshape(w_in * cin, ow * cout))
    return jnp.stack(mats, axis=0)


def _pool_matrices(h_in, w_in, c):
    """0/1 selection matrices so that AvgPool2x2 (floor) = 0.25 * (R @ y2d @ S)."""
    h_out, w_out = h_in // 2, w_in // 2
    R = np.zeros((h_out, h_in), np.float32)
    R[np.arange(h_out), 2 * np.arange(h_out)] = 1.0
    R[np.arange(h_out), 2 * np.arange(h_out) + 1] = 1.0
    S = np.zeros((w_in * c, w_out * c), np.float32)
    px = np.arange(w_out)[:, None]
    ci = np.arange(c)[None, :]
    cols = (px * c + ci).ravel()
    for b in (0, 1):
        rows = ((2 * px + b) * c + ci).ravel()
        S[rows, cols] = 1.0
    return jnp.asarray(R), jnp.asarray(S)


# ----------------------------------------------------------------------------
# Fused kernel: whole LeNet forward for one image per grid step.
# ----------------------------------------------------------------------------
def _make_lenet_kernel(oh1, oh2, oh3, kh):
    def kernel(x_ref, t1, b1, r1, s1, t2, b2, r2, s2, t3, b3, wf, bf,
               o_ref, p1, p2):
        def dot(a, b):
            return jnp.dot(a, b, preferred_element_type=jnp.float32)

        def conv_tanh(rows, t_ref, b_ref, oh):
            # valid 3x3 conv as kh shifted-row matmuls vs. block-Toeplitz weights
            acc = dot(rows(0, oh), t_ref[0])
            for dy in range(1, kh):
                acc = acc + dot(rows(dy, oh), t_ref[dy])
            return jnp.tanh(acc + b_ref[...])

        def pool_tanh(y, r_ref, s_ref):
            # AvgPool2x2 + Tanh: row-pair and column-block-pair selection on MXU
            return jnp.tanh(0.25 * dot(dot(r_ref[...], y), s_ref[...]))

        # conv1 + tanh -> pool + tanh   (result kept in VMEM scratch p1)
        y = conv_tanh(lambda dy, oh: x_ref[0, dy:dy + oh, :], t1, b1, oh1)
        p1[...] = pool_tanh(y, r1, s1)
        # conv2 + tanh -> pool + tanh   (VMEM scratch p2)
        y = conv_tanh(lambda dy, oh: p1[dy:dy + oh, :], t2, b2, oh2)
        p2[...] = pool_tanh(y, r2, s2)
        # conv3 + tanh
        y = conv_tanh(lambda dy, oh: p2[dy:dy + oh, :], t3, b3, oh3)
        # GAP + Linear: the 1/(OH3*OW3) mean is folded into wf; single tiny store.
        o_ref[0] = jnp.sum(dot(y, wf[...]), axis=0, keepdims=True) + bf[...]

    return kernel


# ----------------------------------------------------------------------------
# Forward pass (equivalent to LeNet.forward -> self.output, i.e. logits)
# ----------------------------------------------------------------------------
def lenet_forward(x_nchw, params):
    w1, b1, w2, b2, w3, b3, wf, bf = params
    N, cin, H, W = x_nchw.shape
    kh, kw = w1.shape[0], w1.shape[1]
    c1, c2, c3 = w1.shape[3], w2.shape[3], w3.shape[3]
    n_out = wf.shape[1]

    # NCHW -> NHWC -> per-image 2D slab (H, W*C); channels fastest (lane dim).
    x2d = jnp.transpose(x_nchw, (0, 2, 3, 1)).astype(jnp.float32).reshape(N, H, W * cin)

    # Spatial sizes through the network (valid conv, floor pool).
    oh1, ow1 = H - kh + 1, W - kw + 1          # conv1 out
    ph1, pw1 = oh1 // 2, ow1 // 2              # pool1 out
    oh2, ow2 = ph1 - kh + 1, pw1 - kw + 1      # conv2 out
    ph2, pw2 = oh2 // 2, ow2 // 2              # pool2 out
    oh3, ow3 = ph2 - kh + 1, pw2 - kw + 1      # conv3 out

    # Weight-only preprocessing.
    t1 = _conv_toeplitz(w1, W)
    t2 = _conv_toeplitz(w2, pw1)
    t3 = _conv_toeplitz(w3, pw2)
    r1m, s1m = _pool_matrices(oh1, ow1, c1)
    r2m, s2m = _pool_matrices(oh2, ow2, c2)
    b1r = jnp.tile(b1, ow1)[None, :]
    b2r = jnp.tile(b2, ow2)[None, :]
    b3r = jnp.tile(b3, ow3)[None, :]
    wf_big = jnp.concatenate([wf] * ow3, axis=0) / float(oh3 * ow3)
    bfr = bf[None, :]

    consts = (t1, b1r, r1m, s1m, t2, b2r, r2m, s2m, t3, b3r, wf_big, bfr)

    def const_spec(a):
        nd = a.ndim
        return pl.BlockSpec(a.shape, lambda n, _nd=nd: (0,) * _nd)

    # Advisory cost estimate for XLA scheduling around the custom call.
    flops = 2 * N * (kh * oh1 * (W * cin) * (ow1 * c1)
                     + ph1 * oh1 * (ow1 * c1) + ph1 * (ow1 * c1) * (pw1 * c1)
                     + kh * oh2 * (pw1 * c1) * (ow2 * c2)
                     + ph2 * oh2 * (ow2 * c2) + ph2 * (ow2 * c2) * (pw2 * c2)
                     + kh * oh3 * (pw2 * c2) * (ow3 * c3)
                     + oh3 * (ow3 * c3) * n_out)
    transcendentals = N * (oh1 * ow1 * c1 + ph1 * pw1 * c1 + oh2 * ow2 * c2
                           + ph2 * pw2 * c2 + oh3 * ow3 * c3)
    bytes_accessed = 4 * (x2d.size + sum(int(c.size) for c in consts) + N * n_out)

    out = pl.pallas_call(
        _make_lenet_kernel(oh1, oh2, oh3, kh),
        out_shape=jax.ShapeDtypeStruct((N, 1, n_out), jnp.float32),
        grid=(N,),
        in_specs=[pl.BlockSpec((1, H, W * cin), lambda n: (n, 0, 0))]
                 + [const_spec(c) for c in consts],
        out_specs=pl.BlockSpec((1, 1, n_out), lambda n: (n, 0, 0)),
        scratch_shapes=[pltpu.VMEM((ph1, pw1 * c1), jnp.float32),
                        pltpu.VMEM((ph2, pw2 * c2), jnp.float32)],
        compiler_params=pltpu.CompilerParams(dimension_semantics=("parallel",)),
        cost_estimate=pl.CostEstimate(flops=flops,
                                      transcendentals=transcendentals,
                                      bytes_accessed=bytes_accessed),
    )(x2d, *consts)
    return out.reshape(N, n_out)


# ----------------------------------------------------------------------------
# Pure-JAX reference for validation.
# ----------------------------------------------------------------------------
def lenet_ref(x_nchw, params):
    w1, b1, w2, b2, w3, b3, wf, bf = params
    x = jnp.transpose(x_nchw, (0, 2, 3, 1)).astype(jnp.float32)

    def conv(x, w, b):
        y = jax.lax.conv_general_dilated(
            x, w, window_strides=(1, 1), padding="VALID",
            dimension_numbers=("NHWC", "HWIO", "NHWC"))
        return jnp.tanh(y + b)

    def pool(x):
        N, H, W, C = x.shape
        H2, W2 = H // 2, W // 2
        xc = x[:, :H2 * 2, :W2 * 2, :].reshape(N, H2, 2, W2, 2, C)
        return jnp.tanh(xc.mean(axis=(2, 4)))

    y = conv(x, w1, b1); y = pool(y)
    y = conv(y, w2, b2); y = pool(y)
    y = conv(y, w3, b3)
    gap = y.mean(axis=(1, 2))
    return gap @ wf + bf


# ----------------------------------------------------------------------------
# Deterministic parameter construction + run
# ----------------------------------------------------------------------------
def make_params(key):
    ks = jax.random.split(key, 8)

    def trunc(k, shape, std=0.1):  # mirrors init_weights: truncnorm(-2, 2) * 0.1
        return (std * jax.random.truncated_normal(k, -2.0, 2.0, shape)).astype(jnp.float32)

    w1 = trunc(ks[0], (3, 3, 3, 6));    b1 = trunc(ks[1], (6,))
    w2 = trunc(ks[2], (3, 3, 6, 16));   b2 = trunc(ks[3], (16,))
    w3 = trunc(ks[4], (3, 3, 16, 120)); b3 = trunc(ks[5], (120,))
    wf = trunc(ks[6], (120, 8));        bf = trunc(ks[7], (8,))
    return (w1, b1, w2, b2, w3, b3, wf, bf)


if __name__ == "__main__":
    root = jax.random.PRNGKey(0)
    k_params, k_x = jax.random.split(root)
    params = make_params(k_params)

    # NCHW input, 3 channels; 32x32 keeps all valid convs/pools positive:
    # 32 -> 30 -> 15 -> 13 -> 6 -> 4 -> GAP -> Linear(120, 8).
    x = jax.random.normal(k_x, (2, 3, 32, 32), dtype=jnp.float32)

    fwd = jax.jit(lenet_forward)
    out = jax.block_until_ready(fwd(x, params))
    ref = jax.block_until_ready(lenet_ref(x, params))

    assert out.shape == (2, 8), out.shape
    # Tolerance covers MXU f32 rounding in the matmul-based pool/GAP path.
    assert jnp.allclose(out, ref, atol=5e-3, rtol=5e-3), float(jnp.max(jnp.abs(out - ref)))

    print("KERNEL_OK")
</pallas_src>

<mosaic_0001>
module attributes {stable_mosaic.version = 11 : i64} {
  func.func @kernel(%arg0: i32, %arg1: memref<1x32x96xf32, #tpu.memory_space<vmem>>, %arg2: memref<3x96x180xf32, #tpu.memory_space<vmem>>, %arg3: memref<1x180xf32, #tpu.memory_space<vmem>>, %arg4: memref<15x30xf32, #tpu.memory_space<vmem>>, %arg5: memref<180x90xf32, #tpu.memory_space<vmem>>, %arg6: memref<3x90x208xf32, #tpu.memory_space<vmem>>, %arg7: memref<1x208xf32, #tpu.memory_space<vmem>>, %arg8: memref<6x13xf32, #tpu.memory_space<vmem>>, %arg9: memref<208x96xf32, #tpu.memory_space<vmem>>, %arg10: memref<3x96x480xf32, #tpu.memory_space<vmem>>, %arg11: memref<1x480xf32, #tpu.memory_space<vmem>>, %arg12: memref<480x8xf32, #tpu.memory_space<vmem>>, %arg13: memref<1x8xf32, #tpu.memory_space<vmem>>, %arg14: memref<1x1x8xf32, #tpu.memory_space<vmem>>, %arg15: memref<15x90xf32, #tpu.memory_space<vmem>>, %arg16: memref<6x96xf32, #tpu.memory_space<vmem>>) attributes {dimension_semantics = [#tpu.dimension_semantics<parallel>], iteration_bounds = array<i64: 2>, scalar_prefetch = 0 : i64, scratch_operands = 2 : i64, tpu.core_type = #tpu.core_type<tc>, window_params = [{transform_indices = @transform_0, window_bounds = array<i64: 1, 32, 96>}, {pipeline_mode = #tpu.pipeline_mode<synchronous>, transform_indices = @transform_1, window_bounds = array<i64: 3, 96, 180>}, {pipeline_mode = #tpu.pipeline_mode<synchronous>, transform_indices = @transform_2, window_bounds = array<i64: 1, 180>}, {pipeline_mode = #tpu.pipeline_mode<synchronous>, transform_indices = @transform_3, window_bounds = array<i64: 15, 30>}, {pipeline_mode = #tpu.pipeline_mode<synchronous>, transform_indices = @transform_4, window_bounds = array<i64: 180, 90>}, {pipeline_mode = #tpu.pipeline_mode<synchronous>, transform_indices = @transform_5, window_bounds = array<i64: 3, 90, 208>}, {pipeline_mode = #tpu.pipeline_mode<synchronous>, transform_indices = @transform_6, window_bounds = array<i64: 1, 208>}, {pipeline_mode = #tpu.pipeline_mode<synchronous>, transform_indices = @transform_7, window_bounds = array<i64: 6, 13>}, {pipeline_mode = #tpu.pipeline_mode<synchronous>, transform_indices = @transform_8, window_bounds = array<i64: 208, 96>}, {pipeline_mode = #tpu.pipeline_mode<synchronous>, transform_indices = @transform_9, window_bounds = array<i64: 3, 96, 480>}, {pipeline_mode = #tpu.pipeline_mode<synchronous>, transform_indices = @transform_10, window_bounds = array<i64: 1, 480>}, {pipeline_mode = #tpu.pipeline_mode<synchronous>, transform_indices = @transform_11, window_bounds = array<i64: 480, 8>}, {pipeline_mode = #tpu.pipeline_mode<synchronous>, transform_indices = @transform_12, window_bounds = array<i64: 1, 8>}, {transform_indices = @transform_13, window_bounds = array<i64: 1, 1, 8>}]} {
    %c0 = arith.constant 0 : index
    %c0_0 = arith.constant 0 : index
    %c0_1 = arith.constant 0 : index
    %0 = vector.load %arg1[%c0, %c0_0, %c0_1] : memref<1x32x96xf32, #tpu.memory_space<vmem>>, vector<1x30x96xf32>
    %1 = vector.shape_cast %0 : vector<1x30x96xf32> to vector<30x96xf32>
    %c0_2 = arith.constant 0 : index
    %c0_3 = arith.constant 0 : index
    %c0_4 = arith.constant 0 : index
    %2 = vector.load %arg2[%c0_2, %c0_3, %c0_4] : memref<3x96x180xf32, #tpu.memory_space<vmem>>, vector<1x96x180xf32>
    %3 = vector.shape_cast %2 : vector<1x96x180xf32> to vector<96x180xf32>
    %cst = arith.constant dense<0.000000e+00> : vector<30x180xf32>
    %4 = tpu.matmul %1, %3, %cst {dimension_numbers = #tpu.dot_dimension_numbers<[1], [0], [0], [1], [0, 0, 1, 1], [], []>} : vector<30x96xf32>, vector<96x180xf32>, vector<30x180xf32> -> vector<30x180xf32>
    %c0_5 = arith.constant 0 : index
    %c1 = arith.constant 1 : index
    %c0_6 = arith.constant 0 : index
    %5 = vector.load %arg1[%c0_5, %c1, %c0_6] : memref<1x32x96xf32, #tpu.memory_space<vmem>>, vector<1x30x96xf32>
    %6 = vector.shape_cast %5 : vector<1x30x96xf32> to vector<30x96xf32>
    %c1_7 = arith.constant 1 : index
    %c0_8 = arith.constant 0 : index
    %c0_9 = arith.constant 0 : index
    %7 = vector.load %arg2[%c1_7, %c0_8, %c0_9] : memref<3x96x180xf32, #tpu.memory_space<vmem>>, vector<1x96x180xf32>
    %8 = vector.shape_cast %7 : vector<1x96x180xf32> to vector<96x180xf32>
    %cst_10 = arith.constant dense<0.000000e+00> : vector<30x180xf32>
    %9 = tpu.matmul %6, %8, %cst_10 {dimension_numbers = #tpu.dot_dimension_numbers<[1], [0], [0], [1], [0, 0, 1, 1], [], []>} : vector<30x96xf32>, vector<96x180xf32>, vector<30x180xf32> -> vector<30x180xf32>
    %10 = arith.addf %4, %9 : vector<30x180xf32>
    %c0_11 = arith.constant 0 : index
    %c2 = arith.constant 2 : index
    %c0_12 = arith.constant 0 : index
    %11 = vector.load %arg1[%c0_11, %c2, %c0_12] : memref<1x32x96xf32, #tpu.memory_space<vmem>>, vector<1x30x96xf32>
    %12 = vector.shape_cast %11 : vector<1x30x96xf32> to vector<30x96xf32>
    %c2_13 = arith.constant 2 : index
    %c0_14 = arith.constant 0 : index
    %c0_15 = arith.constant 0 : index
    %13 = vector.load %arg2[%c2_13, %c0_14, %c0_15] : memref<3x96x180xf32, #tpu.memory_space<vmem>>, vector<1x96x180xf32>
    %14 = vector.shape_cast %13 : vector<1x96x180xf32> to vector<96x180xf32>
    %cst_16 = arith.constant dense<0.000000e+00> : vector<30x180xf32>
    %15 = tpu.matmul %12, %14, %cst_16 {dimension_numbers = #tpu.dot_dimension_numbers<[1], [0], [0], [1], [0, 0, 1, 1], [], []>} : vector<30x96xf32>, vector<96x180xf32>, vector<30x180xf32> -> vector<30x180xf32>
    %16 = arith.addf %10, %15 : vector<30x180xf32>
    %c0_17 = arith.constant 0 : index
    %c0_18 = arith.constant 0 : index
    %17 = vector.load %arg3[%c0_17, %c0_18] : memref<1x180xf32, #tpu.memory_space<vmem>>, vector<1x180xf32>
    %18 = vector.broadcast %17 : vector<1x180xf32> to vector<30x180xf32>
    %19 = arith.addf %16, %18 : vector<30x180xf32>
    %20 = math.tanh %19 : vector<30x180xf32>
    %c0_19 = arith.constant 0 : index
    %c0_20 = arith.constant 0 : index
    %21 = vector.load %arg4[%c0_19, %c0_20] : memref<15x30xf32, #tpu.memory_space<vmem>>, vector<15x30xf32>
    %cst_21 = arith.constant dense<0.000000e+00> : vector<15x180xf32>
    %22 = tpu.matmul %21, %20, %cst_21 {dimension_numbers = #tpu.dot_dimension_numbers<[1], [0], [0], [1], [0, 0, 1, 1], [], []>} : vector<15x30xf32>, vector<30x180xf32>, vector<15x180xf32> -> vector<15x180xf32>
    %c0_22 = arith.constant 0 : index
    %c0_23 = arith.constant 0 : index
    %23 = vector.load %arg5[%c0_22, %c0_23] : memref<180x90xf32, #tpu.memory_space<vmem>>, vector<180x90xf32>
    %cst_24 = arith.constant dense<0.000000e+00> : vector<15x90xf32>
    %24 = tpu.matmul %22, %23, %cst_24 {dimension_numbers = #tpu.dot_dimension_numbers<[1], [0], [0], [1], [0, 0, 1, 1], [], []>} : vector<15x180xf32>, vector<180x90xf32>, vector<15x90xf32> -> vector<15x90xf32>
    %cst_25 = arith.constant 2.500000e-01 : f32
    %25 = vector.broadcast %cst_25 : f32 to vector<15x90xf32>
    %26 = arith.mulf %25, %24 : vector<15x90xf32>
    %27 = math.tanh %26 : vector<15x90xf32>
    %c0_26 = arith.constant 0 : index
    %c0_27 = arith.constant 0 : index
    %28 = vector.load %arg15[%c0_26, %c0_27] : memref<15x90xf32, #tpu.memory_space<vmem>>, vector<15x90xf32>
    tpu.vector_store %arg15[%c0_26, %c0_27], %27 {strides = array<i32>} : memref<15x90xf32, #tpu.memory_space<vmem>>, vector<15x90xf32>,
    %c0_28 = arith.constant 0 : index
    %c0_29 = arith.constant 0 : index
    %29 = vector.load %arg15[%c0_28, %c0_29] : memref<15x90xf32, #tpu.memory_space<vmem>>, vector<13x90xf32>
    %c0_30 = arith.constant 0 : index
    %c0_31 = arith.constant 0 : index
    %c0_32 = arith.constant 0 : index
    %30 = vector.load %arg6[%c0_30, %c0_31, %c0_32] : memref<3x90x208xf32, #tpu.memory_space<vmem>>, vector<1x90x208xf32>
    %31 = vector.shape_cast %30 : vector<1x90x208xf32> to vector<90x208xf32>
    %cst_33 = arith.constant dense<0.000000e+00> : vector<13x208xf32>
    %32 = tpu.matmul %29, %31, %cst_33 {dimension_numbers = #tpu.dot_dimension_numbers<[1], [0], [0], [1], [0, 0, 1, 1], [], []>} : vector<13x90xf32>, vector<90x208xf32>, vector<13x208xf32> -> vector<13x208xf32>
    %c1_34 = arith.constant 1 : index
    %c0_35 = arith.constant 0 : index
    %33 = vector.load %arg15[%c1_34, %c0_35] : memref<15x90xf32, #tpu.memory_space<vmem>>, vector<13x90xf32>
    %c1_36 = arith.constant 1 : index
    %c0_37 = arith.constant 0 : index
    %c0_38 = arith.constant 0 : index
    %34 = vector.load %arg6[%c1_36, %c0_37, %c0_38] : memref<3x90x208xf32, #tpu.memory_space<vmem>>, vector<1x90x208xf32>
    %35 = vector.shape_cast %34 : vector<1x90x208xf32> to vector<90x208xf32>
    %cst_39 = arith.constant dense<0.000000e+00> : vector<13x208xf32>
    %36 = tpu.matmul %33, %35, %cst_39 {dimension_numbers = #tpu.dot_dimension_numbers<[1], [0], [0], [1], [0, 0, 1, 1], [], []>} : vector<13x90xf32>, vector<90x208xf32>, vector<13x208xf32> -> vector<13x208xf32>
    %37 = arith.addf %32, %36 : vector<13x208xf32>
    %c2_40 = arith.constant 2 : index
    %c0_41 = arith.constant 0 : index
    %38 = vector.load %arg15[%c2_40, %c0_41] : memref<15x90xf32, #tpu.memory_space<vmem>>, vector<13x90xf32>
    %c2_42 = arith.constant 2 : index
    %c0_43 = arith.constant 0 : index
    %c0_44 = arith.constant 0 : index
    %39 = vector.load %arg6[%c2_42, %c0_43, %c0_44] : memref<3x90x208xf32, #tpu.memory_space<vmem>>, vector<1x90x208xf32>
    %40 = vector.shape_cast %39 : vector<1x90x208xf32> to vector<90x208xf32>
    %cst_45 = arith.constant dense<0.000000e+00> : vector<13x208xf32>
    %41 = tpu.matmul %38, %40, %cst_45 {dimension_numbers = #tpu.dot_dimension_numbers<[1], [0], [0], [1], [0, 0, 1, 1], [], []>} : vector<13x90xf32>, vector<90x208xf32>, vector<13x208xf32> -> vector<13x208xf32>
    %42 = arith.addf %37, %41 : vector<13x208xf32>
    %c0_46 = arith.constant 0 : index
    %c0_47 = arith.constant 0 : index
    %43 = vector.load %arg7[%c0_46, %c0_47] : memref<1x208xf32, #tpu.memory_space<vmem>>, vector<1x208xf32>
    %44 = vector.broadcast %43 : vector<1x208xf32> to vector<13x208xf32>
    %45 = arith.addf %42, %44 : vector<13x208xf32>
    %46 = math.tanh %45 : vector<13x208xf32>
    %c0_48 = arith.constant 0 : index
    %c0_49 = arith.constant 0 : index
    %47 = vector.load %arg8[%c0_48, %c0_49] : memref<6x13xf32, #tpu.memory_space<vmem>>, vector<6x13xf32>
    %cst_50 = arith.constant dense<0.000000e+00> : vector<6x208xf32>
    %48 = tpu.matmul %47, %46, %cst_50 {dimension_numbers = #tpu.dot_dimension_numbers<[1], [0], [0], [1], [0, 0, 1, 1], [], []>} : vector<6x13xf32>, vector<13x208xf32>, vector<6x208xf32> -> vector<6x208xf32>
    %c0_51 = arith.constant 0 : index
    %c0_52 = arith.constant 0 : index
    %49 = vector.load %arg9[%c0_51, %c0_52] : memref<208x96xf32, #tpu.memory_space<vmem>>, vector<208x96xf32>
    %cst_53 = arith.constant dense<0.000000e+00> : vector<6x96xf32>
    %50 = tpu.matmul %48, %49, %cst_53 {dimension_numbers = #tpu.dot_dimension_numbers<[1], [0], [0], [1], [0, 0, 1, 1], [], []>} : vector<6x208xf32>, vector<208x96xf32>, vector<6x96xf32> -> vector<6x96xf32>
    %cst_54 = arith.constant 2.500000e-01 : f32
    %51 = vector.broadcast %cst_54 : f32 to vector<6x96xf32>
    %52 = arith.mulf %51, %50 : vector<6x96xf32>
    %53 = math.tanh %52 : vector<6x96xf32>
    %c0_55 = arith.constant 0 : index
    %c0_56 = arith.constant 0 : index
    %54 = vector.load %arg16[%c0_55, %c0_56] : memref<6x96xf32, #tpu.memory_space<vmem>>, vector<6x96xf32>
    tpu.vector_store %arg16[%c0_55, %c0_56], %53 {strides = array<i32>} : memref<6x96xf32, #tpu.memory_space<vmem>>, vector<6x96xf32>,
    %c0_57 = arith.constant 0 : index
    %c0_58 = arith.constant 0 : index
    %55 = vector.load %arg16[%c0_57, %c0_58] : memref<6x96xf32, #tpu.memory_space<vmem>>, vector<4x96xf32>
    %c0_59 = arith.constant 0 : index
    %c0_60 = arith.constant 0 : index
    %c0_61 = arith.constant 0 : index
    %56 = vector.load %arg10[%c0_59, %c0_60, %c0_61] : memref<3x96x480xf32, #tpu.memory_space<vmem>>, vector<1x96x480xf32>
    %57 = vector.shape_cast %56 : vector<1x96x480xf32> to vector<96x480xf32>
    %cst_62 = arith.constant dense<0.000000e+00> : vector<4x480xf32>
    %58 = tpu.matmul %55, %57, %cst_62 {dimension_numbers = #tpu.dot_dimension_numbers<[1], [0], [0], [1], [0, 0, 1, 1], [], []>} : vector<4x96xf32>, vector<96x480xf32>, vector<4x480xf32> -> vector<4x480xf32>
    %c1_63 = arith.constant 1 : index
    %c0_64 = arith.constant 0 : index
    %59 = vector.load %arg16[%c1_63, %c0_64] : memref<6x96xf32, #tpu.memory_space<vmem>>, vector<4x96xf32>
    %c1_65 = arith.constant 1 : index
    %c0_66 = arith.constant 0 : index
    %c0_67 = arith.constant 0 : index
    %60 = vector.load %arg10[%c1_65, %c0_66, %c0_67] : memref<3x96x480xf32, #tpu.memory_space<vmem>>, vector<1x96x480xf32>
    %61 = vector.shape_cast %60 : vector<1x96x480xf32> to vector<96x480xf32>
    %cst_68 = arith.constant dense<0.000000e+00> : vector<4x480xf32>
    %62 = tpu.matmul %59, %61, %cst_68 {dimension_numbers = #tpu.dot_dimension_numbers<[1], [0], [0], [1], [0, 0, 1, 1], [], []>} : vector<4x96xf32>, vector<96x480xf32>, vector<4x480xf32> -> vector<4x480xf32>
    %63 = arith.addf %58, %62 : vector<4x480xf32>
    %c2_69 = arith.constant 2 : index
    %c0_70 = arith.constant 0 : index
    %64 = vector.load %arg16[%c2_69, %c0_70] : memref<6x96xf32, #tpu.memory_space<vmem>>, vector<4x96xf32>
    %c2_71 = arith.constant 2 : index
    %c0_72 = arith.constant 0 : index
    %c0_73 = arith.constant 0 : index
    %65 = vector.load %arg10[%c2_71, %c0_72, %c0_73] : memref<3x96x480xf32, #tpu.memory_space<vmem>>, vector<1x96x480xf32>
    %66 = vector.shape_cast %65 : vector<1x96x480xf32> to vector<96x480xf32>
    %cst_74 = arith.constant dense<0.000000e+00> : vector<4x480xf32>
    %67 = tpu.matmul %64, %66, %cst_74 {dimension_numbers = #tpu.dot_dimension_numbers<[1], [0], [0], [1], [0, 0, 1, 1], [], []>} : vector<4x96xf32>, vector<96x480xf32>, vector<4x480xf32> -> vector<4x480xf32>
    %68 = arith.addf %63, %67 : vector<4x480xf32>
    %c0_75 = arith.constant 0 : index
    %c0_76 = arith.constant 0 : index
    %69 = vector.load %arg11[%c0_75, %c0_76] : memref<1x480xf32, #tpu.memory_space<vmem>>, vector<1x480xf32>
    %70 = vector.broadcast %69 : vector<1x480xf32> to vector<4x480xf32>
    %71 = arith.addf %68, %70 : vector<4x480xf32>
    %72 = math.tanh %71 : vector<4x480xf32>
    %c0_77 = arith.constant 0 : index
    %c0_78 = arith.constant 0 : index
    %73 = vector.load %arg12[%c0_77, %c0_78] : memref<480x8xf32, #tpu.memory_space<vmem>>, vector<480x8xf32>
    %cst_79 = arith.constant dense<0.000000e+00> : vector<4x8xf32>
    %74 = tpu.matmul %72, %73, %cst_79 {dimension_numbers = #tpu.dot_dimension_numbers<[1], [0], [0], [1], [0, 0, 1, 1], [], []>} : vector<4x480xf32>, vector<480x8xf32>, vector<4x8xf32> -> vector<4x8xf32>
    %cst_80 = arith.constant dense<0.000000e+00> : vector<8xf32>
    %75 = vector.multi_reduction <add>, %74, %cst_80 [0] : vector<4x8xf32> to vector<8xf32>
    %76 = vector.shape_cast %75 : vector<8xf32> to vector<1x8xf32>
    %c0_81 = arith.constant 0 : index
    %c0_82 = arith.constant 0 : index
    %77 = vector.load %arg13[%c0_81, %c0_82] : memref<1x8xf32, #tpu.memory_space<vmem>>, vector<1x8xf32>
    %78 = arith.addf %76, %77 : vector<1x8xf32>
    %c0_83 = arith.constant 0 : index
    %c0_84 = arith.constant 0 : index
    %c0_85 = arith.constant 0 : index
    %79 = vector.load %arg14[%c0_83, %c0_84, %c0_85] : memref<1x1x8xf32, #tpu.memory_space<vmem>>, vector<1x1x8xf32>
    %80 = vector.shape_cast %79 : vector<1x1x8xf32> to vector<1x8xf32>
    %81 = vector.shape_cast %78 : vector<1x8xf32> to vector<1x1x8xf32>
    tpu.vector_store %arg14[%c0_83, %c0_84, %c0_85], %81 {strides = array<i32>} : memref<1x1x8xf32, #tpu.memory_space<vmem>>, vector<1x1x8xf32>,
    return
  }
  func.func @transform_0(%arg0: i32) -> (i32, i32, i32) {
    %c0_i32 = arith.constant 0 : i32
    %c0_i32_0 = arith.constant 0 : i32
    %c0_i32_1 = arith.constant 0 : i32
    return %arg0, %c0_i32, %c0_i32_0 : i32, i32, i32
  }
  func.func @transform_1(%arg0: i32) -> (i32, i32, i32) {
    %c0_i32 = arith.constant 0 : i32
    %c0_i32_0 = arith.constant 0 : i32
    %c0_i32_1 = arith.constant 0 : i32
    %c0_i32_2 = arith.constant 0 : i32
    return %c0_i32, %c0_i32_0, %c0_i32_1 : i32, i32, i32
  }
  func.func @transform_2(%arg0: i32) -> (i32, i32) {
    %c0_i32 = arith.constant 0 : i32
    %c0_i32_0 = arith.constant 0 : i32
    %c0_i32_1 = arith.constant 0 : i32
    return %c0_i32, %c0_i32_0 : i32, i32
  }
  func.func @transform_3(%arg0: i32) -> (i32, i32) {
    %c0_i32 = arith.constant 0 : i32
    %c0_i32_0 = arith.constant 0 : i32
    %c0_i32_1 = arith.constant 0 : i32
    return %c0_i32, %c0_i32_0 : i32, i32
  }
  func.func @transform_4(%arg0: i32) -> (i32, i32) {
    %c0_i32 = arith.constant 0 : i32
    %c0_i32_0 = arith.constant 0 : i32
    %c0_i32_1 = arith.constant 0 : i32
    return %c0_i32, %c0_i32_0 : i32, i32
  }
  func.func @transform_5(%arg0: i32) -> (i32, i32, i32) {
    %c0_i32 = arith.constant 0 : i32
    %c0_i32_0 = arith.constant 0 : i32
    %c0_i32_1 = arith.constant 0 : i32
    %c0_i32_2 = arith.constant 0 : i32
    return %c0_i32, %c0_i32_0, %c0_i32_1 : i32, i32, i32
  }
  func.func @transform_6(%arg0: i32) -> (i32, i32) {
    %c0_i32 = arith.constant 0 : i32
    %c0_i32_0 = arith.constant 0 : i32
    %c0_i32_1 = arith.constant 0 : i32
    return %c0_i32, %c0_i32_0 : i32, i32
  }
  func.func @transform_7(%arg0: i32) -> (i32, i32) {
    %c0_i32 = arith.constant 0 : i32
    %c0_i32_0 = arith.constant 0 : i32
    %c0_i32_1 = arith.constant 0 : i32
    return %c0_i32, %c0_i32_0 : i32, i32
  }
  func.func @transform_8(%arg0: i32) -> (i32, i32) {
    %c0_i32 = arith.constant 0 : i32
    %c0_i32_0 = arith.constant 0 : i32
    %c0_i32_1 = arith.constant 0 : i32
    return %c0_i32, %c0_i32_0 : i32, i32
  }
  func.func @transform_9(%arg0: i32) -> (i32, i32, i32) {
    %c0_i32 = arith.constant 0 : i32
    %c0_i32_0 = arith.constant 0 : i32
    %c0_i32_1 = arith.constant 0 : i32
    %c0_i32_2 = arith.constant 0 : i32
    return %c0_i32, %c0_i32_0, %c0_i32_1 : i32, i32, i32
  }
  func.func @transform_10(%arg0: i32) -> (i32, i32) {
    %c0_i32 = arith.constant 0 : i32
    %c0_i32_0 = arith.constant 0 : i32
    %c0_i32_1 = arith.constant 0 : i32
    return %c0_i32, %c0_i32_0 : i32, i32
  }
  func.func @transform_11(%arg0: i32) -> (i32, i32) {
    %c0_i32 = arith.constant 0 : i32
    %c0_i32_0 = arith.constant 0 : i32
    %c0_i32_1 = arith.constant 0 : i32
    return %c0_i32, %c0_i32_0 : i32, i32
  }
  func.func @transform_12(%arg0: i32) -> (i32, i32) {
    %c0_i32 = arith.constant 0 : i32
    %c0_i32_0 = arith.constant 0 : i32
    %c0_i32_1 = arith.constant 0 : i32
    return %c0_i32, %c0_i32_0 : i32, i32
  }
  func.func @transform_13(%arg0: i32) -> (i32, i32, i32) {
    %c0_i32 = arith.constant 0 : i32
    %c0_i32_0 = arith.constant 0 : i32
    %c0_i32_1 = arith.constant 0 : i32
    return %arg0, %c0_i32, %c0_i32_0 : i32, i32, i32
  }
}

</mosaic_0001>

<bundles_post_ra>
// kernel: tile.18
= control target key start
LH: loop header
LB: loop body
LE: loop exit
PB: predicated region body
PF: predicated region fallthrough
CT: control target
= control target key end

     0   :  { %s40_s0 = inlined_call_operand.vmem [shape: f32[6], index: 0, kind: input, shape index: {}]   ;;  %s41_s1 = inlined_call_operand.vmem [shape: f32[30,6], index: 1, kind: output, shape index: {}]  }
   0x1   :  { %v4_v0 = vld [vmem:[%s40_s0] ss:$0 sm:$0xff] }
   0x2   :  { %5 = vst [vmem:[%s41_s1] sm:$0xff] %v4_v0  ;;  %12 = vst [vmem:[%s41_s1 + $0x8] sm:$0xff] %v4_v0 }
   0x3   :  { %13 = vst [vmem:[%s41_s1 + $0x10] sm:$0xff] %v4_v0  ;;  %14 = vst [vmem:[%s41_s1 + $0x18] sm:$0xff] %v4_v0 }

// kernel: tile.19
= control target key start
LH: loop header
LB: loop body
LE: loop exit
PB: predicated region body
PF: predicated region fallthrough
CT: control target
= control target key end

     0   :  { %vm9_vm0 = vcmask 15360   ;;  %s268_s12 = smov 126   ;;  %s269_s13 = smov 114   ;;  %vm3_vm1 = vcmask 48128   ;;  %vm13_vm2 = vcmask 31744   ;;  %vm16_vm3 = vcmask 1048560   ;;  %s406_s0 = inlined_call_operand.vmem [shape: f32[30,6], index: 0, kind: input, shape index: {}]   ;;  %s407_s1 = inlined_call_operand.vmem [shape: f32[1,180], index: 1, kind: output, shape index: {}]  }
   0x1   :  { %v208_v0 = vld [vmem:[%s406_s0 + $0x15] sm:$0x1]   ;;  %v211_v3 = vld [vmem:[%s406_s0 + $0x13] sm:$0x1]   ;;  %v210_v4 = vld [vmem:[%s406_s0 + $0x14] sm:$0x1]  }
   0x2   :  { %v209_v1 = vld [vmem:[%s406_s0 + $0x15] sm:$0x1]   ;;  %26 = vrot.lane.b32.xlu1 %v211_v3, %s269_s13  ;;  %v212_v5 = vld [vmem:[%s406_s0 + $0x12] sm:$0x1]   ;;  %s270_s18 = smov 120   ;;  %s271_s19 = smov 108  }
   0x3   :  { %v10_v2 = vsel %vm9_vm0, %v209_v1, %v208_v0  ;;  %v213_v6 = vld [vmem:[%s406_s0 + $0x11] sm:$0x1]   ;;  %v214_v7 = vld [vmem:[%s406_s0 + $0x10] sm:$0x1]   ;;  %s272_s24 = smov 102   ;;  %s273_s25 = smov 96  }
   0x4   :  { %11 = vrot.lane.b32.xlu0 %v10_v2, %s268_s12  ;;  %v215_v8 = vld [vmem:[%s406_s0 + $0xf] sm:$0x1]   ;;  %v216_v9 = vld [vmem:[%s406_s0 + $0xe] sm:$0x1]   ;;  %s274_s30 = smov 90   ;;  %s275_s2 = smov 84  }
   0x5   :  { %v217_v10 = vld [vmem:[%s406_s0 + $0xd] sm:$0x1]   ;;  %v218_v11 = vld [vmem:[%s406_s0 + $0xc] sm:$0x1]   ;;  %v2_v12 = vld [vmem:[%s406_s0] sm:$0x1]  }
   0x6   :  { %32 = vrot.lane.b32.xlu1 %v212_v5, %s271_s19  ;;  %4 = vst.msk [vmem:[#allocation0] sm:$0x1] %vm3_vm1, %v2_v12   ;;  %s276_s9 = smov 78   ;;  %s277_s10 = smov 72   ;;  %v219_v13 = vld [vmem:[%s406_s0 + $0xb] sm:$0x1]  }
   0x7   :  { %v220_v14 = vld [vmem:[%s406_s0 + $0xa] sm:$0x1]   ;;  %s278_s15 = smov 66   ;;  %s279_s16 = smov 60   ;;  %v221_v15 = vld [vmem:[%s406_s0 + $0x9] sm:$0x1]  }
   0x8   :  { %20 = vrot.lane.b32.xlu0 %v210_v4, %s270_s18  ;;  %v222_v16 = vld [vmem:[%s406_s0 + $0x8] sm:$0x1]   ;;  %s280_s21 = smov 54   ;;  %s281_s22 = smov 48   ;;  %v223_v17 = vld [vmem:[%s406_s0 + $0x1d] sm:$0x1]  }
   0x9   :  { %v224_v18 = vld [vmem:[%s406_s0 + $0x7] sm:$0x1]   ;;  %s282_s27 = smov 46   ;;  %s283_s28 = smov 42   ;;  %v225_v19 = vld [vmem:[%s406_s0 + $0x1c] sm:$0x1]  }
   0xa   :  { %44 = vrot.lane.b32.xlu1 %v214_v7, %s273_s25  ;;  %v226_v20 = vld [vmem:[%s406_s0 + $0x6] sm:$0x1]   ;;  %s284_s4 = smov 40   ;;  %s285_s5 = smov 36   ;;  %v227_v21 = vld [vmem:[%s406_s0 + $0x1b] sm:$0x1]  }
   0xb   :  { %v228_v22 = vld [vmem:[%s406_s0 + $0x5] sm:$0x1]   ;;  %s287_s11 = smov 30   ;;  %v229_v23 = vld [vmem:[%s406_s0 + $0x1a] sm:$0x1]   ;;  %s289_s17 = smov 24  }
   0xc   :  { %38 = vrot.lane.b32.xlu0 %v213_v6, %s272_s24  ;;  %v230_v24 = vld [vmem:[%s406_s0 + $0x4] sm:$0x1]   ;;  %v231_v25 = vld [vmem:[%s406_s0 + $0x19] sm:$0x1]   ;;  %v232_v26 = vld [vmem:[%s406_s0 + $0x3] sm:$0x1]  }
   0xd   :  { %s291_s23 = smov 18   ;;  %v233_v27 = vld [vmem:[%s406_s0 + $0x18] sm:$0x1]   ;;  %v234_v28 = vld [vmem:[%s406_s0 + $0x2] sm:$0x1]   ;;  %s293_s29 = smov 12  }
   0xe   :  { %56 = vrot.lane.b32.xlu1 %v216_v9, %s275_s2  ;;  %v235_v29 = vld [vmem:[%s406_s0 + $0x17] sm:$0x1]   ;;  %v236_v30 = vld [vmem:[%s406_s0 + $0x1] sm:$0x1]   ;;  %s295_s6 = smov 6   ;;  %vm22_vm4 = vcmask 1032128  }
   0xf   :  { %v237_v31 = vld [vmem:[%s406_s0 + $0x16] sm:$0x1]   ;;  %s296_s0 = smov 4   ;;  %vm28_vm5 = vcmask 982928   ;;  %vm34_vm6 = vcmask 933728   ;;  %vm40_vm7 = vcmask 884528  }
  0x10   :  { %50 = vrot.lane.b32.xlu0 %v215_v8, %s274_s30  ;;  %vm46_vm8 = vcmask 835328   ;;  %vm52_vm9 = vcmask 786128   ;;  %vm58_vm10 = vcmask 736928   ;;  %vm64_vm11 = vcmask 687728  }
  0x11   :  { %vm70_vm12 = vcmask 638528   ;;  %vm76_vm13 = vcmask 589328   ;;  %vm82_vm14 = vcmask 540128   ;;  %vm88_vm15 = vcmask 490928  }
  0x12   :  { %68 = vrot.lane.b32.xlu1 %v218_v11, %s277_s10  ;;  %s286_s10 = smov 34   ;;  %vm94_vm0 = vcmask 441728   ;;  %vm100_vm1 = vcmask 425328  }
  0x14   :  { %62 = vrot.lane.b32.xlu0 %v217_v10, %s276_s9 }
  0x16   :  { %80 = vrot.lane.b32.xlu1 %v220_v14, %s279_s16  ;;  %s288_s16 = smov 28  }
  0x18   :  { %74 = vrot.lane.b32.xlu0 %v219_v13, %s278_s15 }
  0x1a   :  { %92 = vrot.lane.b32.xlu1 %v222_v16, %s281_s22  ;;  %s290_s22 = smov 22  }
  0x1c   :  { %86 = vrot.lane.b32.xlu0 %v221_v15, %s280_s21 }
  0x1e   :  { %105 = vrot.lane.b32.xlu1 %v224_v18, %s283_s28  ;;  %s292_s28 = smov 16  }
  0x20   :  { %98 = vrot.lane.b32.xlu0 %v223_v17, %s282_s27 }
  0x22   :  { %118 = vrot.lane.b32.xlu1 %v226_v20, %s285_s5  ;;  %s294_s5 = smov 10  }
  0x24   :  { %111 = vrot.lane.b32.xlu0 %v225_v19, %s284_s4 }
  0x26   :  { %131 = vrot.lane.b32.xlu1 %v228_v22, %s287_s11 }
  0x28   :  { %124 = vrot.lane.b32.xlu0 %v227_v21, %s286_s10 }
  0x2a   :  { %144 = vrot.lane.b32.xlu1 %v230_v24, %s289_s17 }
  0x2c   :  { %137 = vrot.lane.b32.xlu0 %v229_v23, %s288_s16 }
  0x2e   :  { %157 = vrot.lane.b32.xlu1 %v232_v26, %s291_s23 }
  0x30   :  { %150 = vrot.lane.b32.xlu0 %v231_v25, %s290_s22 }
  0x32   :  { %170 = vrot.lane.b32.xlu1 %v234_v28, %s293_s29 }
  0x34   :  { %163 = vrot.lane.b32.xlu0 %v233_v27, %s292_s28 }
  0x36   :  { %183 = vrot.lane.b32.xlu1 %v236_v30, %s295_s6 }
  0x38   :  { %176 = vrot.lane.b32.xlu0 %v235_v29, %s294_s5 }
  0x3c   :  { %189 = vrot.lane.b32.xlu0 %v237_v31, %s296_s0 }
  0x74   :  { %v27_v33 = vpop.permute.xlu1 %26  }
  0x76   :  { %v12_v32 = vpop.permute.xlu0 %11  }
  0x77   :  { %15 = vst.msk [vmem:[#allocation0 + $0x8] sm:$0x1] %vm13_vm2, %v12_v32   ;;  %vm107_vm2 = vcmask 392528  }
  0x78   :  { %17 = vst.msk [vmem:[#allocation0] sm:$0x1] %vm16_vm3, %v12_v32   ;;  %v33_v35 = vpop.permute.xlu1 %32   ;;  %vm113_vm3 = vcmask 376128  }
  0x7a   :  { %v21_v34 = vpop.permute.xlu0 %20  }
  0x7b   :  { %23 = vst.msk [vmem:[#allocation0] sm:$0x1] %vm22_vm4, %v21_v34   ;;  %vm120_vm4 = vcmask 343328  }
  0x7c   :  { %29 = vst.msk [vmem:[#allocation0] sm:$0x1] %vm28_vm5, %v27_v33   ;;  %v45_v37 = vpop.permute.xlu1 %44   ;;  %vm126_vm5 = vcmask 326928  }
  0x7d   :  { %35 = vst.msk [vmem:[#allocation0] sm:$0x1] %vm34_vm6, %v33_v35   ;;  %vm133_vm6 = vcmask 294128  }
  0x7e   :  { %v39_v36 = vpop.permute.xlu0 %38  }
  0x7f   :  { %41 = vst.msk [vmem:[#allocation0] sm:$0x1] %vm40_vm7, %v39_v36   ;;  %vm139_vm7 = vcmask 277728  }
  0x80   :  { %47 = vst.msk [vmem:[#allocation0] sm:$0x1] %vm46_vm8, %v45_v37   ;;  %v57_v39 = vpop.permute.xlu1 %56   ;;  %vm146_vm8 = vcmask 244928  }
  0x82   :  { %v51_v38 = vpop.permute.xlu0 %50  }
  0x83   :  { %53 = vst.msk [vmem:[#allocation0] sm:$0x1] %vm52_vm9, %v51_v38   ;;  %vm152_vm9 = vcmask 228528  }
  0x84   :  { %59 = vst.msk [vmem:[#allocation0] sm:$0x1] %vm58_vm10, %v57_v39   ;;  %v69_v41 = vpop.permute.xlu1 %68   ;;  %vm159_vm10 = vcmask 195728  }
  0x86   :  { %v63_v40 = vpop.permute.xlu0 %62  }
  0x87   :  { %65 = vst.msk [vmem:[#allocation0] sm:$0x1] %vm64_vm11, %v63_v40   ;;  %vm165_vm11 = vcmask 179328  }
  0x88   :  { %71 = vst.msk [vmem:[#allocation0] sm:$0x1] %vm70_vm12, %v69_v41   ;;  %v81_v43 = vpop.permute.xlu1 %80   ;;  %vm172_vm12 = vcmask 146528  }
  0x8a   :  { %v75_v42 = vpop.permute.xlu0 %74  }
  0x8b   :  { %77 = vst.msk [vmem:[#allocation0] sm:$0x1] %vm76_vm13, %v75_v42   ;;  %vm178_vm13 = vcmask 130128  }
  0x8c   :  { %83 = vst.msk [vmem:[#allocation0] sm:$0x1] %vm82_vm14, %v81_v43   ;;  %v93_v45 = vpop.permute.xlu1 %92   ;;  %vm185_vm14 = vcmask 97328  }
  0x8e   :  { %v87_v44 = vpop.permute.xlu0 %86  }
  0x8f   :  { %89 = vst.msk [vmem:[#allocation0] sm:$0x1] %vm88_vm15, %v87_v44   ;;  %vm191_vm15 = vcmask 80928  }
  0x90   :  { %95 = vst.msk [vmem:[#allocation0] sm:$0x1] %vm94_vm0, %v93_v45   ;;  %v106_v47 = vpop.permute.xlu1 %105  }
  0x91   :  { %108 = vst.msk [vmem:[#allocation0] sm:$0x1] %vm107_vm2, %v106_v47  }
  0x92   :  { %v99_v46 = vpop.permute.xlu0 %98  }
  0x93   :  { %102 = vst.msk [vmem:[#allocation0 + $0x8] sm:$0x1] %vm100_vm1, %v99_v46  }
  0x94   :  { %v119_v49 = vpop.permute.xlu1 %118  }
  0x95   :  { %121 = vst.msk [vmem:[#allocation0] sm:$0x1] %vm120_vm4, %v119_v49  }
  0x96   :  { %v112_v48 = vpop.permute.xlu0 %111  }
  0x97   :  { %115 = vst.msk [vmem:[#allocation0 + $0x8] sm:$0x1] %vm113_vm3, %v112_v48  }
  0x98   :  { %v132_v51 = vpop.permute.xlu1 %131  }
  0x99   :  { %134 = vst.msk [vmem:[#allocation0] sm:$0x1] %vm133_vm6, %v132_v51  }
  0x9a   :  { %v125_v50 = vpop.permute.xlu0 %124  }
  0x9b   :  { %128 = vst.msk [vmem:[#allocation0 + $0x8] sm:$0x1] %vm126_vm5, %v125_v50  }
  0x9c   :  { %v145_v53 = vpop.permute.xlu1 %144  }
  0x9d   :  { %147 = vst.msk [vmem:[#allocation0] sm:$0x1] %vm146_vm8, %v145_v53  }
  0x9e   :  { %v138_v52 = vpop.permute.xlu0 %137  }
  0x9f   :  { %141 = vst.msk [vmem:[#allocation0 + $0x8] sm:$0x1] %vm139_vm7, %v138_v52  }
  0xa0   :  { %v158_v55 = vpop.permute.xlu1 %157  }
  0xa1   :  { %160 = vst.msk [vmem:[#allocation0] sm:$0x1] %vm159_vm10, %v158_v55  }
  0xa2   :  { %v151_v54 = vpop.permute.xlu0 %150  }
  0xa3   :  { %154 = vst.msk [vmem:[#allocation0 + $0x8] sm:$0x1] %vm152_vm9, %v151_v54  }
  0xa4   :  { %v171_v57 = vpop.permute.xlu1 %170  }
  0xa5   :  { %173 = vst.msk [vmem:[#allocation0] sm:$0x1] %vm172_vm12, %v171_v57  }
  0xa6   :  { %v164_v56 = vpop.permute.xlu0 %163  }
  0xa7   :  { %167 = vst.msk [vmem:[#allocation0 + $0x8] sm:$0x1] %vm165_vm11, %v164_v56  }
  0xa8   :  { %v184_v59 = vpop.permute.xlu1 %183  }
  0xa9   :  { %186 = vst.msk [vmem:[#allocation0] sm:$0x1] %vm185_vm14, %v184_v59  }
  0xaa   :  { %v177_v58 = vpop.permute.xlu0 %176  }
  0xab   :  { %180 = vst.msk [vmem:[#allocation0 + $0x8] sm:$0x1] %vm178_vm13, %v177_v58  }
  0xae   :  { %v190_v60 = vpop.permute.xlu0 %189  }
  0xaf   :  { %193 = vst.msk [vmem:[#allocation0 + $0x8] sm:$0x1] %vm191_vm15, %v190_v60  }
  0xb0   :  { %v198_v61 = vld [vmem:[#allocation0] sm:$0x1] }
  0xb1   :  { %201 = vst [vmem:[%s407_s1] sm:$0x1] %v198_v61 }
  0xb6   :  { %v203_v62 = vld [vmem:[#allocation0 + $0x8] sm:$0x1] }
  0xb7   :  { %238 = vst [vmem:[%s407_s1 + $0x1] sm:$0x1] %v203_v62 }

// kernel: tile.23
= control target key start
LH: loop header
LB: loop body
LE: loop exit
PB: predicated region body
PF: predicated region fallthrough
CT: control target
= control target key end

     0   :  { %s28_s0 = inlined_call_operand.vmem [shape: f32[16], index: 0, kind: input, shape index: {}]   ;;  %s29_s1 = inlined_call_operand.vmem [shape: f32[13,16], index: 1, kind: output, shape index: {}]  }
   0x1   :  { %v4_v0 = vld [vmem:[%s28_s0] ss:$0 sm:$0xff] }
   0x2   :  { %5 = vst [vmem:[%s29_s1] sm:$0xff] %v4_v0  ;;  %8 = vst [vmem:[%s29_s1 + $0x8] sm:$0xff] %v4_v0 }

// kernel: tile.24
= control target key start
LH: loop header
LB: loop body
LE: loop exit
PB: predicated region body
PF: predicated region fallthrough
CT: control target
= control target key end

     0   :  { %s81_s10 = smov 112   ;;  %s82_s11 = smov 80   ;;  %vm4_vm0 = vcmask 130048   ;;  %vm10_vm1 = vcmask 1048448   ;;  %vm16_vm2 = vcmask 917248   ;;  %vm22_vm3 = vcmask 786048   ;;  %s128_s0 = inlined_call_operand.vmem [shape: f32[13,16], index: 0, kind: input, shape index: {}]   ;;  %s129_s1 = inlined_call_operand.vmem [shape: f32[1,208], index: 1, kind: output, shape index: {}]  }
   0x1   :  { %v66_v0 = vld [vmem:[%s128_s0 + $0x7] sm:$0x1]   ;;  %v68_v1 = vld [vmem:[%s128_s0 + $0x5] sm:$0x1]   ;;  %s25_s12 = smov 3  ;;  %s32_s17 = smov 3 }
   0x2   :  { %8 = vrot.lane.b32.xlu0 %v66_v0, %s81_s10  ;;  %20 = vrot.lane.b32.xlu1 %v68_v1, %s82_s11  ;;  %v67_v2 = vld [vmem:[%s128_s0 + $0x6] sm:$0x1]   ;;  %s39_s18 = smov 3  ;;  %s83_s19 = smov 96   ;;  %vm29_vm4 = vcmask 654848   ;;  %vm36_vm5 = vcmask 523648  }
   0x3   :  { %v69_v3 = vld [vmem:[%s128_s0 + $0x4] ss:$8 sm:%s25_s12]   ;;  %s84_s20 = smov 64   ;;  %v70_v4 = vld [vmem:[%s128_s0 + $0x3] ss:$8 sm:%s32_s17]   ;;  %s2_s23 = smov 3 }
   0x4   :  { %v71_v5 = vld [vmem:[%s128_s0 + $0x2] ss:$8 sm:%s39_s18]   ;;  %v3_v6 = vld [vmem:[%s128_s0] ss:$8 sm:%s2_s23]   ;;  %s46_s28 = smov 3  ;;  %s85_s29 = smov 48  }
   0x5   :  { %5 = vst.msk [vmem:[#allocation0] ss:$8 sm:$0x3] %vm4_vm0, %v3_v6   ;;  %s86_s30 = smov 32   ;;  %v72_v7 = vld [vmem:[%s128_s0 + $0x1] ss:$8 sm:%s46_s28]  }
   0x6   :  { %14 = vrot.lane.b32.xlu0 %v67_v2, %s83_s19  ;;  %27 = vrot.lane.b32.xlu1 %v69_v3, %s84_s20  ;;  %s87_s0 = smov 16   ;;  %vm43_vm6 = vcmask 392448   ;;  %vm50_vm7 = vcmask 261248  }
   0xa   :  { %34 = vrot.lane.b32.xlu0 %v70_v4, %s85_s29  ;;  %41 = vrot.lane.b32.xlu1 %v71_v5, %s86_s30 }
   0xe   :  { %48 = vrot.lane.b32.xlu0 %v72_v7, %s87_s0 }
  0x74   :  { %v9_v8 = vpop.permute.xlu0 %8   ;;  %v21_v9 = vpop.permute.xlu1 %20  }
  0x75   :  { %11 = vst.msk [vmem:[#allocation0] sm:$0x1] %vm10_vm1, %v9_v8  }
  0x78   :  { %v15_v10 = vpop.permute.xlu0 %14   ;;  %v28_v11 = vpop.permute.xlu1 %27  }
  0x79   :  { %17 = vst.msk [vmem:[#allocation0] sm:$0x1] %vm16_vm2, %v15_v10  }
  0x7a   :  { %23 = vst.msk [vmem:[#allocation0] sm:$0x1] %vm22_vm3, %v21_v9  }
  0x7b   :  { %30 = vst.msk [vmem:[#allocation0] ss:$8 sm:$0x3] %vm29_vm4, %v28_v11  }
  0x7c   :  { %v35_v12 = vpop.permute.xlu0 %34   ;;  %v42_v13 = vpop.permute.xlu1 %41  }
  0x7d   :  { %37 = vst.msk [vmem:[#allocation0] ss:$8 sm:$0x3] %vm36_vm5, %v35_v12  }
  0x7e   :  { %44 = vst.msk [vmem:[#allocation0] ss:$8 sm:$0x3] %vm43_vm6, %v42_v13  }
  0x80   :  { %v49_v14 = vpop.permute.xlu0 %48  }
  0x81   :  { %51 = vst.msk [vmem:[#allocation0] ss:$8 sm:$0x3] %vm50_vm7, %v49_v14  }
  0x88   :  { %v56_v15 = vld [vmem:[#allocation0] sm:$0x1]  ;;  %v61_v16 = vld [vmem:[#allocation0 + $0x8] sm:$0x1] }
  0x89   :  { %59 = vst [vmem:[%s129_s1] sm:$0x1] %v56_v15  ;;  %73 = vst [vmem:[%s129_s1 + $0x1] sm:$0x1] %v61_v16 }

// kernel: tile.28
= control target key start
LH: loop header
LB: loop body
LE: loop exit
PB: predicated region body
PF: predicated region fallthrough
CT: control target
= control target key end

     0   :  { %s22_s0 = inlined_call_operand.vmem [shape: f32[120], index: 0, kind: input, shape index: {}]   ;;  %s23_s1 = inlined_call_operand.vmem [shape: f32[4,120], index: 1, kind: output, shape index: {}]  }
   0x1   :  { %v4_v0 = vld [vmem:[%s22_s0] ss:$0 sm:$0xff] }
   0x2   :  { %5 = vst [vmem:[%s23_s1] sm:$0xf] %v4_v0 }

// kernel: tile.29
= control target key start
LH: loop header
LB: loop body
LE: loop exit
PB: predicated region body
PF: predicated region fallthrough
CT: control target
= control target key end

     0   :  { %vm14_vm0 = vcmask 64512   ;;  %vm27_vm1 = vcmask 130048   ;;  %vm41_vm2 = vcmask 195584   ;;  %vm8_vm3 = vcmask 982016   ;;  %s88_s8 = smov 104   ;;  %s89_s9 = smov 112   ;;  %s115_s0 = inlined_call_operand.vmem [shape: f32[4,120], index: 0, kind: input, shape index: {}]   ;;  %s116_s1 = inlined_call_operand.vmem [shape: f32[1,480], index: 1, kind: output, shape index: {}]  }
   0x1   :  { %v5_v0 = vld [vmem:[%s115_s0] sm:$0xf]  ;;  %s87_s0 = smov 120   ;;  %vm18_vm4 = vcmask 916480   ;;  %vm21_vm5 = vcmask 1048512   ;;  %vm45_vm6 = vcmask 785408  }
   0x2   :  { %6 = vst [vmem:[#allocation1] sm:$0xf] %v5_v0  ;;  %vm31_vm7 = vcmask 850944   ;;  %vm34_vm8 = vcmask 1048448   ;;  %vm48_vm9 = vcmask 1048384  }
   0x9   :  { %v11_v1 = vld [vmem:[#allocation1 + $0x1] sm:$0x1]   ;;  %v24_v3 = vld [vmem:[#allocation1 + $0x2] sm:$0x1]   ;;  %v38_v6 = vld [vmem:[#allocation1 + $0x3] sm:$0x1]  }
   0xa   :  { %v13_v2 = vld [vmem:[#allocation1 + $0x1] sm:$0x1]   ;;  %v26_v5 = vld [vmem:[#allocation1 + $0x2] sm:$0x1]   ;;  %v40_v7 = vld [vmem:[#allocation1 + $0x3] sm:$0x1]  }
   0xb   :  { %v15_v4 = vsel %vm14_vm0, %v13_v2, %v11_v1  ;;  %v42_v8 = vsel %vm41_vm2, %v40_v7, %v38_v6  ;;  %v7_v9 = vld [vmem:[#allocation1] sm:$0x1]   ;;  %v28_v10 = vsel %vm27_vm1, %v26_v5, %v24_v3 }
   0xc   :  { %16 = vrot.lane.b32.xlu0 %v15_v4, %s87_s0  ;;  %43 = vrot.lane.b32.xlu1 %v42_v8, %s88_s8  ;;  %9 = vst.msk [vmem:[#allocation0] sm:$0x1] %vm8_vm3, %v7_v9  }
  0x10   :  { %29 = vrot.lane.b32.xlu0 %v28_v10, %s89_s9 }
  0x7e   :  { %v17_v11 = vpop.permute.xlu0 %16   ;;  %v44_v12 = vpop.permute.xlu1 %43  }
  0x7f   :  { %20 = vst.msk [vmem:[#allocation0 + $0x8] sm:$0x1] %vm18_vm4, %v17_v11  }
  0x80   :  { %22 = vst.msk [vmem:[#allocation0] sm:$0x1] %vm21_vm5, %v17_v11  }
  0x81   :  { %47 = vst.msk [vmem:[#allocation0 + $0x18] sm:$0x1] %vm45_vm6, %v44_v12  }
  0x82   :  { %v30_v13 = vpop.permute.xlu0 %29  }
  0x83   :  { %33 = vst.msk [vmem:[#allocation0 + $0x10] sm:$0x1] %vm31_vm7, %v30_v13  }
  0x84   :  { %36 = vst.msk [vmem:[#allocation0 + $0x8] sm:$0x1] %vm34_vm8, %v30_v13  }
  0x85   :  { %50 = vst.msk [vmem:[#allocation0 + $0x10] sm:$0x1] %vm48_vm9, %v44_v12  }
  0x87   :  { %v55_v14 = vld [vmem:[#allocation0] sm:$0x1] }
  0x88   :  { %58 = vst [vmem:[%s116_s1] sm:$0x1] %v55_v14  ;;  %v73_v15 = vld [vmem:[#allocation0 + $0x18] sm:$0x1] }
  0x89   :  { %83 = vst [vmem:[%s116_s1 + $0x3] sm:$0x1] %v73_v15 }
  0x8b   :  { %v60_v16 = vld [vmem:[#allocation0 + $0x8] sm:$0x1] }
  0x8c   :  { %81 = vst [vmem:[%s116_s1 + $0x1] sm:$0x1] %v60_v16  ;;  %v66_v17 = vld [vmem:[#allocation0 + $0x10] sm:$0x1] }
  0x8d   :  { %82 = vst [vmem:[%s116_s1 + $0x2] sm:$0x1] %v66_v17 }

// kernel: lenet_forward.1
= control target key start
LH: loop header
LB: loop body
LE: loop exit
PB: predicated region body
PF: predicated region fallthrough
CT: control target
= control target key end

     0   :  { %18 = vsyncpa [#allocation5], 0  ;;  %s4507_s0 = inlined_call_operand.vmem [shape: f32[2,32,96], index: 0, kind: input, shape index: {}]   ;;  %s4508_s1 = inlined_call_operand.vmem [shape: f32[3,96,180], index: 1, kind: input, shape index: {}]   ;;  %s4509_s2 = inlined_call_operand.vmem [shape: f32[1,180], index: 2, kind: input, shape index: {}]   ;;  %s4510_s3 = inlined_call_operand.vmem [shape: f32[15,30], index: 3, kind: input, shape index: {}]   ;;  %s4511_s4 = inlined_call_operand.vmem [shape: f32[180,90], index: 4, kind: input, shape index: {}]   ;;  %s4512_s5 = inlined_call_operand.vmem [shape: f32[3,90,208], index: 5, kind: input, shape index: {}]   ;;  %s4513_s6 = inlined_call_operand.vmem [shape: f32[1,208], index: 6, kind: input, shape index: {}]   ;;  %s4514_s7 = inlined_call_operand.vmem [shape: f32[6,13], index: 7, kind: input, shape index: {}]   ;;  %s4515_s8 = inlined_call_operand.vmem [shape: f32[208,96], index: 8, kind: input, shape index: {}]   ;;  %s4516_s9 = inlined_call_operand.vmem [shape: f32[3,96,480], index: 9, kind: input, shape index: {}]   ;;  %s4517_s10 = inlined_call_operand.vmem [shape: f32[1,480], index: 10, kind: input, shape index: {}]   ;;  %s4518_s11 = inlined_call_operand.vmem [shape: f32[480,8], index: 11, kind: input, shape index: {}]   ;;  %s4519_s12 = inlined_call_operand.vmem [shape: f32[1,8], index: 12, kind: input, shape index: {}]   ;;  %s4520_s13 = inlined_call_operand.hbm [shape: f32[2,1,8], index: 13, kind: output, shape index: {}]  }
   0x1   :  { %20 = vsyncpa [#allocation5 + $0x1], 0  ;;  %s3025_s25 = smov 0   ;;  %s3027_s26 = smov 0  }
   0x2   :  { %s3029_s27 = smov 0   ;;  %s3031_s28 = smov 0  }
   0x3 LB: > { %4525 = sst [smem:[#allocation7_spill]] %s2947_s27  ;;  %s3046_s29 = sadd.s32 4294967295, %s2951_s28   ;;  %s2951_s28 = sphi %s3031_s28, %s4532_s28   ;;  %s2947_s27 = sphi %s3029_s27, %s4534_s27   ;;  %s2943_s26 = sphi %s3027_s26, %s4536_s26   ;;  %s2939_s25 = sphi %s3025_s25, %s4535_s25  }
   0x4   : > { %s2534_s30 = sadd.s32 4294967294, %s2951_s28   ;;  %s3050_s14 = sadd.s32 1, %s2951_s28  }
   0x5   : > { %4526 = sst [smem:[#allocation8_spill]] %s3050_s14  ;;  %s311_s15 = sadd.s32 1, %s2947_s27 }
   0x6   : > { %s308_s16 = ssub.s32 %s2951_s28, %s3050_s14  ;;  %p321_p0 = scmp.ne.s32.totalorder %s2947_s27, %s2943_s26 }
   0x7   : > { %p309_p1 = scmp.eq.s32.totalorder %s308_s16, 0  ;;  %p322_p2 = scmp.eq.s32.totalorder %s3046_s29, 1 }
   0x8   : > { %p327_p3 = scmp.ne.s32.totalorder %s2943_s26, %s2939_s25  ;;  %p328_p4 = scmp.eq.s32.totalorder %s2534_s30, 1 }
   0x9   : > { %s3061_s17 = scalar_select %p309_p1, %s2947_s27, %s311_s15  }
   0xa   : > { %p3063_p5 = por %p322_p2, %p321_p0  ;;  %p3067_p6 = por %p328_p4, %p327_p3 }
   0xb   : > { %4527 = sst [smem:[#allocation9_spill]] %s3061_s17  ;;  %p2537_p7 = scmp.ge.s32.totalorder %s2951_s28, 1 }
   0xc   : > { %s4529_s19 = scalar_select %p3067_p6, 1, 0 }
   0xd   : > { %p390_p8 = scmp.lt.s32.totalorder %s2951_s28, 3 }
   0xe   : > { %4530 = sst [smem:[#allocation10_spill]] %s4529_s19 }
   0xf   : > { %p391_p9 = pnand %p2537_p7, %p390_p8 }
  0x10   : > { %p433_p10 = scmp.lt.s32.totalorder (!%p391_p9), %s3046_s29, 1  ;;  %s431_s30 = sand.u32 (!%p391_p9), 1, %s2943_s26  }
  0x11   : > { %394 = sbr.rel (%p391_p9) target bundleno = 1894 (0x766), region = 72  ;;  %s2774_s27 = sshll.u32 (!%p391_p9), %s3046_s29, 4 }
  0x12   : > { %s2477_s20 = scalar_lea.hbm (!%p391_p9), %s4520_s13, %s2774_s27  ;;  %s2467_s22 = scalar_lea.sflag (!%p391_p9), [#allocation5], %s431_s30 }
  0x13   : > { %s2954_s23 = smov (!%p391_p9), [#allocation4]  }
  0x14   : > { %s2895_s15 = sshll.u32 (!%p391_p9), %s2954_s23, 4  ;;  %s2896_s15 = int_to_ptr.vmem [resolvable:$false] %s2895_s15 }
  0x16   : > { %v2563_v0 = vld [vmem:[%s4508_s1 + $0x178] sm:$0xff]  ;;  %v2562_v2 = vld [vmem:[%s4508_s1 + $0x170] sm:$0xff]  ;;  %v2561_v4 = vld [vmem:[%s4508_s1 + $0x168] sm:$0xff]  ;;  %s3173_s24 = scalar_select %p433_p10, %s3046_s29, 1  ;;  %vm495_vm0 = vcmask 785408   ;;  %v2953_v50 = vmov 0.0  }
  0x17   : > { %v465_v1 = vld [vmem:[%s4508_s1 + $0xb8] sm:$0xff]  ;;  %516 = vmatprep.subr.mxu0 %v2563_v0  ;;  %v464_v3 = vld [vmem:[%s4508_s1 + $0xb0] sm:$0xff]  ;;  %v463_v5 = vld [vmem:[%s4508_s1 + $0xa8] sm:$0xff]  ;;  %572 = vmatprep.mubr.f32.mxu0 %v2953_v50  ;;  %vm987_vm1 = vcmask 1043456   ;;  %vm873_vm2 = vcmask 1045504   ;;  %vm866_vm3 = vcmask 244736  }
  0x18   : > { %617 = vmatprep.subr.mxu1 %v465_v1  ;;  %517 = vmatpush1.msra.mxu0 %v2562_v2  ;;  %v2560_v6 = vld [vmem:[%s4508_s1 + $0x160] sm:$0xff]  ;;  %v2559_v8 = vld [vmem:[%s4508_s1 + $0x158] sm:$0xff]  ;;  %v2558_v10 = vld [vmem:[%s4508_s1 + $0x150] sm:$0xff]  ;;  %s2777_s21 = sshll.u32 %s3173_s24, 5  ;;  %vm980_vm4 = vcmask 424960   ;;  %vm1133_vm5 = vcmask 1041408  }
  0x19   : > { %618 = vmatpush1.msra.mxu1 %v464_v3  ;;  %v462_v7 = vld [vmem:[%s4508_s1 + $0xa0] sm:$0xff]  ;;  %518 = vmatprep.subr.mxu0 %v2561_v4  ;;  %v461_v9 = vld [vmem:[%s4508_s1 + $0x98] sm:$0xff]  ;;  %v460_v11 = vld [vmem:[%s4508_s1 + $0x90] sm:$0xff]  ;;  %s3221_s19 = scalar_lea.vmem %s4507_s0, %s2777_s21  ;;  %vm1070_vm6 = vcmask 736256   ;;  %vm1072_vm7 = vcmask 735232   ;;  %vm1451_vm8 = vcmask 1044480  }
  0x1a   : > { %619 = vmatprep.subr.mxu1 %v463_v5  ;;  %519 = vmatpush1.msra.mxu0 %v2560_v6  ;;  %v2557_v12 = vld [vmem:[%s4508_s1 + $0x148] sm:$0xff]  ;;  %v2556_v14 = vld [vmem:[%s4508_s1 + $0x140] sm:$0xff]  ;;  %v2555_v16 = vld [vmem:[%s4508_s1 + $0x138] sm:$0xff]  ;;  %vm1447_vm9 = vcmask 105472   ;;  %vm1555_vm10 = vcmask 654336   ;;  %vm1631_vm11 = vcmask 783360  }
  0x1b   : > { %620 = vmatpush1.msra.mxu1 %v462_v7  ;;  %v459_v13 = vld [vmem:[%s4508_s1 + $0x88] sm:$0xff]  ;;  %520 = vmatprep.subr.mxu0 %v2559_v8  ;;  %v458_v15 = vld [vmem:[%s4508_s1 + $0x80] sm:$0xff]  ;;  %v457_v17 = vld [vmem:[%s4508_s1 + $0x78] sm:$0xff]  ;;  %vm2454_vm12 = vcmask 60416   ;;  %vm2464_vm13 = vcmask 57344   ;;  %s2897_s29 = scalar_lea.vmem %s2896_s15, 32 }
  0x1c   : > { %621 = vmatprep.subr.mxu1 %v461_v9  ;;  %521 = vmatpush1.msra.mxu0 %v2558_v10  ;;  %v2554_v18 = vld [vmem:[%s4508_s1 + $0x130] sm:$0xff]  ;;  %v2553_v20 = vld [vmem:[%s4508_s1 + $0x128] sm:$0xff]  ;;  %v2552_v22 = vld [vmem:[%s4508_s1 + $0x120] sm:$0xff] }
  0x1d   : > { %622 = vmatpush1.msra.mxu1 %v460_v11  ;;  %522 = vmatprep.subr.mxu0 %v2557_v12  ;;  %v456_v19 = vld [vmem:[%s4508_s1 + $0x70] sm:$0xff]  ;;  %v455_v21 = vld [vmem:[%s4508_s1 + $0x68] sm:$0xff]  ;;  %v454_v23 = vld [vmem:[%s4508_s1 + $0x60] sm:$0xff] }
  0x1e   : > { %623 = vmatprep.subr.mxu1 %v459_v13  ;;  %523 = vmatpush1.msra.mxu0 %v2556_v14  ;;  %v2551_v24 = vld [vmem:[%s4508_s1 + $0x118] sm:$0xff]  ;;  %v2550_v26 = vld [vmem:[%s4508_s1 + $0x110] sm:$0xff]  ;;  %v2549_v28 = vld [vmem:[%s4508_s1 + $0x108] sm:$0xff] }
  0x1f   : > { %624 = vmatpush1.msra.mxu1 %v458_v15  ;;  %524 = vmatprep.subr.mxu0 %v2555_v16  ;;  %v453_v25 = vld [vmem:[%s4508_s1 + $0x58] sm:$0xff]  ;;  %v452_v27 = vld [vmem:[%s4508_s1 + $0x50] sm:$0xff]  ;;  %v451_v29 = vld [vmem:[%s4508_s1 + $0x48] sm:$0xff] }
  0x20   : > { %625 = vmatprep.subr.mxu1 %v457_v17  ;;  %525 = vmatpush1.msra.mxu0 %v2554_v18  ;;  %v2548_v30 = vld [vmem:[%s4508_s1 + $0x100] sm:$0xff]  ;;  %v2547_v32 = vld [vmem:[%s4508_s1 + $0xf8] sm:$0xff]  ;;  %v2546_v34 = vld [vmem:[%s4508_s1 + $0xf0] sm:$0xff] }
  0x21   : > { %626 = vmatpush1.msra.mxu1 %v456_v19  ;;  %526 = vmatprep.subr.mxu0 %v2553_v20  ;;  %v450_v31 = vld [vmem:[%s4508_s1 + $0x40] sm:$0xff]  ;;  %v449_v33 = vld [vmem:[%s4508_s1 + $0x38] sm:$0xff]  ;;  %v448_v35 = vld [vmem:[%s4508_s1 + $0x30] sm:$0xff] }
  0x22   : > { %627 = vmatprep.subr.mxu1 %v455_v21  ;;  %527 = vmatpush1.msra.mxu0 %v2552_v22  ;;  %v2545_v36 = vld [vmem:[%s4508_s1 + $0xe8] sm:$0xff]  ;;  %v2544_v38 = vld [vmem:[%s4508_s1 + $0xe0] sm:$0xff]  ;;  %v2543_v40 = vld [vmem:[%s4508_s1 + $0xd8] sm:$0xff] }
  0x23   : > { %628 = vmatpush1.msra.mxu1 %v454_v23  ;;  %528 = vmatprep.subr.mxu0 %v2551_v24  ;;  %v447_v37 = vld [vmem:[%s4508_s1 + $0x28] sm:$0xff]  ;;  %v446_v39 = vld [vmem:[%s4508_s1 + $0x20] sm:$0xff]  ;;  %v445_v41 = vld [vmem:[%s4508_s1 + $0x18] sm:$0xff] }
  0x24   : > { %629 = vmatprep.subr.mxu1 %v453_v25  ;;  %529 = vmatpush1.msra.mxu0 %v2550_v26  ;;  %v2542_v42 = vld [vmem:[%s4508_s1 + $0xd0] sm:$0xff]  ;;  %v2541_v44 = vld [vmem:[%s4508_s1 + $0xc8] sm:$0xff]  ;;  %v2540_v46 = vld [vmem:[%s4508_s1 + $0xc0] sm:$0xff] }
  0x25   : > { %630 = vmatpush1.msra.mxu1 %v452_v27  ;;  %530 = vmatprep.subr.mxu0 %v2549_v28  ;;  %v444_v43 = vld [vmem:[%s4508_s1 + $0x10] sm:$0xff]  ;;  %v443_v45 = vld [vmem:[%s4508_s1 + $0x8] sm:$0xff]  ;;  %v442_v47 = vld [vmem:[%s4508_s1] sm:$0xff] }
  0x26   : > { %631 = vmatprep.subr.mxu1 %v451_v29  ;;  %531 = vmatpush1.msra.mxu0 %v2548_v30  ;;  %v466_v48 = vld [vmem:[%s3221_s19 + $0x1] sm:$0xff]  ;;  %v2595_v51 = vld [vmem:[%s4508_s1 + $0x238] sm:$0xff]  ;;  %v2594_v52 = vld [vmem:[%s4508_s1 + $0x230] sm:$0xff] }
  0x27   : > { %632 = vmatpush1.msra.mxu1 %v450_v31  ;;  %532 = vmatprep.subr.mxu0 %v2547_v32  ;;  %v438_v49 = vld [vmem:[%s3221_s19] sm:$0xff]  ;;  %v2593_v53 = vld [vmem:[%s4508_s1 + $0x228] sm:$0xff]  ;;  %v2591_v56 = vld [vmem:[%s4508_s1 + $0x218] sm:$0xff] }
  0x28   : > { %633 = vmatprep.subr.mxu1 %v449_v33  ;;  %533 = vmatpush1.msra.mxu0 %v2546_v34  ;;  %v2592_v54 = vld [vmem:[%s4508_s1 + $0x220] sm:$0xff]  ;;  %v439_v55 = vld [vmem:[%s3221_s19 + $0x8] sm:$0xff]  ;;  %v2590_v58 = vld [vmem:[%s4508_s1 + $0x210] sm:$0xff] }
  0x29   : > { %634 = vmatpush1.msra.mxu1 %v448_v35  ;;  %534 = vmatprep.subr.mxu0 %v2545_v36  ;;  %v467_v57 = vld [vmem:[%s3221_s19 + $0x9] sm:$0xff]  ;;  %v2588_v60 = vld [vmem:[%s4508_s1 + $0x200] sm:$0xff]  ;;  %v2587_v62 = vld [vmem:[%s4508_s1 + $0x1f8] sm:$0xff] }
  0x2a   : > { %635 = vmatprep.subr.mxu1 %v447_v37  ;;  %535 = vmatpush1.msra.mxu0 %v2544_v38  ;;  %v2589_v59 = vld [vmem:[%s4508_s1 + $0x208] sm:$0xff]  ;;  %v440_v61 = vld [vmem:[%s3221_s19 + $0x10] sm:$0xff]  ;;  %v2584_v2 = vld [vmem:[%s4508_s1 + $0x1e0] sm:$0xff] }
  0x2b   : > { %636 = vmatpush1.msra.mxu1 %v446_v39  ;;  %536 = vmatprep.subr.mxu0 %v2543_v40  ;;  %v468_v63 = vld [vmem:[%s3221_s19 + $0x11] sm:$0xff]  ;;  %v2585_v1 = vld [vmem:[%s4508_s1 + $0x1e8] sm:$0xff]  ;;  %v469_v5 = vld [vmem:[%s3221_s19 + $0x19] sm:$0x3f] }
  0x2c   : > { %637 = vmatprep.subr.mxu1 %v445_v41  ;;  %537 = vmatpush1.msra.mxu0 %v2542_v42  ;;  %v2586_v0 = vld [vmem:[%s4508_s1 + $0x1f0] sm:$0xff]  ;;  %v441_v3 = vld [vmem:[%s3221_s19 + $0x18] sm:$0x3f]  ;;  %v2581_v7 = vld [vmem:[%s4508_s1 + $0x1c8] sm:$0xff] }
  0x2d   : > { %638 = vmatpush1.msra.mxu1 %v444_v43  ;;  %538 = vmatprep.subr.mxu0 %v2541_v44  ;;  %v2583_v4 = vld [vmem:[%s4508_s1 + $0x1d8] sm:$0xff]  ;;  %v2582_v6 = vld [vmem:[%s4508_s1 + $0x1d0] sm:$0xff]  ;;  %v2580_v8 = vld [vmem:[%s4508_s1 + $0x1c0] sm:$0xff] }
  0x2e   : > { %639 = vmatprep.subr.mxu1 %v443_v45  ;;  %539 = vmatpush1.msra.mxu0 %v2540_v46  ;;  %v2579_v9 = vld [vmem:[%s4508_s1 + $0x1b8] sm:$0xff]  ;;  %v2578_v10 = vld [vmem:[%s4508_s1 + $0x1b0] sm:$0xff]  ;;  %v2577_v11 = vld [vmem:[%s4508_s1 + $0x1a8] sm:$0xff] }
  0x2f   : > { %640 = vmatpush1.msra.mxu1 %v442_v47  ;;  %673 = vmatprep.mubr.f32.mxu1 %v2953_v50  ;;  %v2576_v12 = vld [vmem:[%s4508_s1 + $0x1a0] sm:$0xff]  ;;  %v2575_v13 = vld [vmem:[%s4508_s1 + $0x198] sm:$0xff]  ;;  %v2574_v14 = vld [vmem:[%s4508_s1 + $0x190] sm:$0xff] }
  0x30   : > { %2564 = vmatmul.mubr.msk.f32.vlgmr.msra.gmra.mxu0 %vm495_vm0, %v466_v48  ;;  %2568 = vmatmul.mubr.msk.f32.vlgmr.msra.gmra.mxu1 %vm495_vm0, %v438_v49  ;;  %v2573_v15 = vld [vmem:[%s4508_s1 + $0x188] sm:$0xff]  ;;  %v2572_v16 = vld [vmem:[%s4508_s1 + $0x180] sm:$0xff]  ;;  %v700_v19 = vld [vmem:[%s3221_s19 + $0x12] sm:$0xff] }
  0x31   : > { %747 = vmatprep.subr.mxu0 %v2595_v51  ;;  %578 = vmatprep.mubr.f32.mxu0 %v2953_v50  ;;  %v698_v17 = vld [vmem:[%s3221_s19 + $0x2] sm:$0xff]  ;;  %v699_v18 = vld [vmem:[%s3221_s19 + $0xa] sm:$0xff]  ;;  %v701_v20 = vld [vmem:[%s3221_s19 + $0x1a] sm:$0x3f]  ;;  %s432_s19 = scalar_lea.vmem [#allocation4], %s431_s30 }
  0x32   : > { %748 = vmatpush1.msra.mxu0 %v2594_v52  ;;  %679 = vmatprep.mubr.f32.mxu1 %v2953_v50  ;;  %v972_v21 = vld [vmem:[%s4511_s4 + $0x78] sm:$0xff]  ;;  %v971_v22 = vld [vmem:[%s4511_s4 + $0x70] sm:$0xff]  ;;  %v970_v23 = vld [vmem:[%s4511_s4 + $0x68] sm:$0xff]  ;;  %s2479_s17 = sshll.u32 %s432_s19, 4  ;;  %s2480_s17 = int_to_ptr.vmem [resolvable:$true] %s2479_s17 }
  0x33   : > { %749 = vmatprep.subr.mxu0 %v2593_v53  ;;  %991 = vmatprep.subr.mxu1 %v2953_v50  ;;  %v969_v24 = vld [vmem:[%s4511_s4 + $0x60] sm:$0xff]  ;;  %v968_v25 = vld [vmem:[%s4511_s4 + $0x58] sm:$0xff]  ;;  %v967_v26 = vld [vmem:[%s4511_s4 + $0x50] sm:$0xff]  ;;  %s2891_s14 = scalar_lea.vmem %s2480_s17, 16  ;;  %p2898_p0 = scmp.lt.s32.totalorder %s2480_s17, %s2896_s15 }
  0x34   : > { %750 = vmatpush1.msra.mxu0 %v2592_v54  ;;  %2569 = vmatmul.mubr.msk.f32.gmra.mxu1 %vm495_vm0, %v439_v55  ;;  %v966_v27 = vld [vmem:[%s4511_s4 + $0x48] sm:$0xff]  ;;  %v965_v28 = vld [vmem:[%s4511_s4 + $0x40] sm:$0xff]  ;;  %v964_v29 = vld [vmem:[%s4511_s4 + $0x38] sm:$0xff]  ;;  %p2892_p11 = scmp.ne.s32.totalorder %s2480_s17, %s2891_s14  ;;  %p2899_p1 = scmp.lt.s32.totalorder %s2897_s29, %s2891_s14 }
  0x35   : > { %751 = vmatprep.subr.mxu0 %v2591_v56  ;;  %2565 = vmatmul.mubr.msk.f32.gmra.mxu0 %vm495_vm0, %v467_v57  ;;  %v963_v30 = vld [vmem:[%s4511_s4 + $0x30] sm:$0xff]  ;;  %v962_v31 = vld [vmem:[%s4511_s4 + $0x28] sm:$0xff]  ;;  %v961_v32 = vld [vmem:[%s4511_s4 + $0x20] sm:$0xff] }
  0x36   : > { %752 = vmatpush1.msra.mxu0 %v2590_v58  ;;  %584 = vmatprep.mubr.f32.mxu0 %v2953_v50  ;;  %v960_v33 = vld [vmem:[%s4511_s4 + $0x18] sm:$0xff]  ;;  %v959_v34 = vld [vmem:[%s4511_s4 + $0x10] sm:$0xff]  ;;  %v958_v35 = vld [vmem:[%s4511_s4 + $0x8] sm:$0xff]  ;;  %v838_v58 = vlaneseq  ;;  %p2893_p12 = pnand %p2892_p11, %p3063_p5  ;;  %p2900_p2 = por %p2899_p1, %p2898_p0 }
  0x37   : > { %753 = vmatprep.subr.mxu0 %v2589_v59  ;;  %685 = vmatprep.mubr.f32.mxu1 %v2953_v50  ;;  %v957_v36 = vld [vmem:[%s4511_s4] sm:$0xff]  ;;  %v979_v37 = vld [vmem:[%s4511_s4 + $0xb0] sm:$0xf]  ;;  %v978_v38 = vld [vmem:[%s4511_s4 + $0xa8] sm:$0xff] }
  0x38   : > { %754 = vmatpush1.msra.mxu0 %v2588_v60  ;;  %2570 = vmatmul.mubr.msk.f32.gmra.mxu1 %vm495_vm0, %v440_v61  ;;  %v977_v39 = vld [vmem:[%s4511_s4 + $0xa0] sm:$0xff]  ;;  %v976_v40 = vld [vmem:[%s4511_s4 + $0x98] sm:$0xff]  ;;  %v975_v41 = vld [vmem:[%s4511_s4 + $0x90] sm:$0xff]  ;;  %p2894_p13 = pneg %p2893_p12 }
  0x39   : > { %755 = vmatprep.subr.mxu0 %v2587_v62  ;;  %2566 = vmatmul.mubr.msk.f32.gmra.mxu0 %vm495_vm0, %v468_v63  ;;  %v3423_v62 = vshrl.u32 %v838_v58, 7  ;;  %v2626_v58 = vld [vmem:[%s4512_s5 + $0x158] sm:$0xff] }
  0x3a   : > { %756 = vmatpush1.msra.mxu0 %v2586_v0  ;;  %590 = vmatprep.mubr.f32.mxu0 %v2953_v50  ;;  %p2901_p3 = pnand %p2900_p2, %p2894_p13 }
  0x3b   : > { %757 = vmatprep.subr.mxu0 %v2585_v1  ;;  %691 = vmatprep.mubr.f32.mxu1 %v2953_v50 }
  0x3c   : > { %758 = vmatpush1.msra.mxu0 %v2584_v2  ;;  %2571 = vmatmul.mubr.msk.f32.gmra.mxu1 %vm495_vm0, %v441_v3  ;;  %v3426_v2 = vsub.s32 0, %v3423_v62 }
  0x3d   : > { %759 = vmatprep.subr.mxu0 %v2583_v4  ;;  %2567 = vmatmul.mubr.msk.f32.gmra.mxu0 %vm495_vm0, %v469_v5 }
  0x3e   : > { %760 = vmatpush1.msra.mxu0 %v2582_v6  ;;  %803 = vmatprep.mubr.f32.mxu0 %v2953_v50  ;;  %v836_v6 = vld [vmem:[%s4509_s2] sm:$0x3] }
  0x3f   : > { %761 = vmatprep.subr.mxu0 %v2581_v7  ;;  %992 = vmatpush1.msra.mxu1 %v972_v21  ;;  %v3432_v7 = vsub.s32 1, %v3423_v62 }
  0x40   : > { %762 = vmatpush1.msra.mxu0 %v2580_v8  ;;  %993 = vmatprep.subr.mxu1 %v2953_v50 }
  0x41   : > { %763 = vmatprep.subr.mxu0 %v2579_v9  ;;  %994 = vmatpush1.msra.mxu1 %v971_v22 }
  0x42   : > { %764 = vmatpush1.msra.mxu0 %v2578_v10  ;;  %995 = vmatprep.subr.mxu1 %v2953_v50 }
  0x43   : > { %765 = vmatprep.subr.mxu0 %v2577_v11  ;;  %996 = vmatpush1.msra.mxu1 %v970_v23 }
  0x44   : > { %766 = vmatpush1.msra.mxu0 %v2576_v12  ;;  %997 = vmatprep.subr.mxu1 %v2953_v50 }
  0x45   : > { %767 = vmatprep.subr.mxu0 %v2575_v13  ;;  %998 = vmatpush1.msra.mxu1 %v969_v24 }
  0x46   : > { %768 = vmatpush1.msra.mxu0 %v2574_v14  ;;  %999 = vmatprep.subr.mxu1 %v2953_v50 }
  0x47   : > { %769 = vmatprep.subr.mxu0 %v2573_v15  ;;  %1000 = vmatpush1.msra.mxu1 %v968_v25  ;;  %v841_v15 = vrot.slane %v836_v6, %v3426_v2 }
  0x48   : > { %770 = vmatpush1.msra.mxu0 %v2572_v16  ;;  %1001 = vmatprep.subr.mxu1 %v2953_v50 }
  0x49   : > { %2596 = vmatmul.mubr.msk.f32.vlgmr.msra.gmra.mxu0 %vm495_vm0, %v698_v17  ;;  %1002 = vmatpush1.msra.mxu1 %v967_v26 }
  0x4a   : > { %809 = vmatprep.mubr.f32.mxu0 %v2953_v50  ;;  %1003 = vmatprep.subr.mxu1 %v2953_v50 }
  0x4b   : > { %1004 = vmatpush1.msra.mxu1 %v966_v27 }
  0x4c   : > { %1005 = vmatprep.subr.mxu1 %v2953_v50 }
  0x4d   : > { %2597 = vmatmul.mubr.msk.f32.gmra.mxu0 %vm495_vm0, %v699_v18  ;;  %1006 = vmatpush1.msra.mxu1 %v965_v28 }
  0x4e   : > { %815 = vmatprep.mubr.f32.mxu0 %v2953_v50  ;;  %1007 = vmatprep.subr.mxu1 %v2953_v50 }
  0x4f   : > { %1008 = vmatpush1.msra.mxu1 %v964_v29 }
  0x50   : > { %1009 = vmatprep.subr.mxu1 %v2953_v50 }
  0x51   : > { %2598 = vmatmul.mubr.msk.f32.gmra.mxu0 %vm495_vm0, %v700_v19  ;;  %1010 = vmatpush1.msra.mxu1 %v963_v30  ;;  %v845_v19 = vrot.slane %v836_v6, %v3432_v7  ;;  %v2621_v6 = vld [vmem:[%s4512_s5 + $0x130] sm:$0xff] }
  0x52   : > { %821 = vmatprep.mubr.f32.mxu0 %v2953_v50  ;;  %1011 = vmatprep.subr.mxu1 %v2953_v50 }
  0x53   : > { %1012 = vmatpush1.msra.mxu1 %v962_v31 }
  0x54   : > { %1013 = vmatprep.subr.mxu1 %v2953_v50 }
  0x55   : > { %2599 = vmatmul.mubr.msk.f32.gmra.mxu0 %vm495_vm0, %v701_v20  ;;  %1014 = vmatpush1.msra.mxu1 %v961_v32 }
  0x56   : > { %944 = vmatprep.mubr.f32.mxu0 %v2953_v50  ;;  %1015 = vmatprep.subr.mxu1 %v2953_v50 }
  0x57   : > { %1016 = vmatpush1.msra.mxu1 %v960_v33 }
  0x58   : > { %1017 = vmatprep.subr.mxu1 %v2953_v50 }
  0x59   : > { %1018 = vmatpush1.msra.mxu1 %v959_v34 }
  0x5a   : > { %1019 = vmatprep.subr.mxu1 %v2953_v50 }
  0x5b   : > { %1020 = vmatpush1.msra.mxu1 %v958_v35 }
  0x5c   : > { %1021 = vmatprep.subr.mxu1 %v2953_v50 }
  0x5d   : > { %1022 = vmatpush1.msra.mxu1 %v957_v36 }
  0x5e   : > { %1041 = vmatprep.subr.mxu1 %v2953_v50 }
  0x5f   : > { %2604 = vmatpush2.msk.msra.mxu1 %vm987_vm1, %v979_v37 }
  0x60   : > { %1043 = vmatprep.subr.mxu1 %v2953_v50 }
  0x61   : > { %1044 = vmatpush2.msra.mxu1 %v978_v38 }
  0x62   : > { %1045 = vmatprep.subr.mxu1 %v2953_v50 }
  0x63   : > { %1046 = vmatpush2.msra.mxu1 %v977_v39 }
  0x64   : > { %1047 = vmatprep.subr.mxu1 %v2953_v50 }
  0x65   : > { %1048 = vmatpush2.msra.mxu1 %v976_v40 }
  0x66   : > { %1049 = vmatprep.subr.mxu1 %v2953_v50 }
  0x67   : > { %1050 = vmatpush2.msra.mxu1 %v975_v41  ;;  %v864_v41 = vld [vmem:[%s4510_s3] sm:$0xff] }
  0x68   : > { %1051 = vmatprep.subr.mxu1 %v2953_v50 }
  0xf0   : > { %v574_v42 = vpop.f32.mrf.mxu0  ;;  %v675_v46 = vpop.f32.mrf.mxu1 }
  0xf1   : > { %v676_v22 = vadd.f32 %v675_v46, %v574_v42 }
  0xf2   : > { %v576_v43 = vpop.f32.mrf.mxu0  ;;  %v677_v48 = vpop.f32.mrf.mxu1 }
  0xf3   : > { %v678_v18 = vadd.f32 %v677_v48, %v576_v43  ;;  %v865_v43 = vld [vmem:[%s4510_s3 + $0x8] sm:$0x7f] }
  0xf4   : > { %v681_v49 = vpop.f32.mrf.mxu1 }
  0xf5   : > { %v580_v44 = vpop.f32.mrf.mxu0 }
  0xf6   : > { %v683_v52 = vpop.f32.mrf.mxu1  ;;  %v682_v14 = vadd.f32 %v681_v49, %v580_v44  ;;  %v974_v44 = vld [vmem:[%s4511_s4 + $0x88] sm:$0xff] }
  0xf7   : > { %v582_v45 = vpop.f32.mrf.mxu0  ;;  %1052 = vmatpush2.msra.mxu1 %v974_v44 }
  0xf8   : > { %v687_v54 = vpop.f32.mrf.mxu1  ;;  %v684_v10 = vadd.f32 %v683_v52, %v582_v45  ;;  %1053 = vmatprep.subr.mxu1 %v2953_v50  ;;  %v973_v45 = vld [vmem:[%s4511_s4 + $0x80] sm:$0xff]  ;;  %v2629_v52 = vld [vmem:[%s4512_s5 + $0x170] sm:$0x3] }
  0xf9   : > { %v586_v47 = vpop.f32.mrf.mxu0  ;;  %1054 = vmatpush2.msra.mxu1 %v973_v45 }
  0xfa   : > { %v689_v57 = vpop.f32.mrf.mxu1  ;;  %v688_v8 = vadd.f32 %v687_v54, %v586_v47  ;;  %v2628_v54 = vld [vmem:[%s4512_s5 + $0x168] sm:$0xff] }
  0xfb   : > { %v588_v51 = vpop.f32.mrf.mxu0 }
  0xfc   : > { %v693_v61 = vpop.f32.mrf.mxu1  ;;  %v690_v4 = vadd.f32 %v689_v57, %v588_v51  ;;  %v2630_v51 = vld [vmem:[%s4512_s5 + $0x178] sm:$0x3]  ;;  %v2660_v57 = vld [vmem:[%s4512_s5 + $0x228] sm:$0xff] }
  0xfd   : > { %v592_v53 = vpop.f32.mrf.mxu0 }
  0xfe   : > { %v695_v1 = vpop.f32.mrf.mxu1  ;;  %v694_v5 = vadd.f32 %v693_v61, %v592_v53  ;;  %v2662_v53 = vld [vmem:[%s4512_s5 + $0x238] sm:$0x3] }
  0xff   : > { %v594_v55 = vpop.f32.mrf.mxu0  ;;  %2663 = vmatprep.subr.msk.mxu1 %vm1133_vm5, %v2662_v53  ;;  %v2658_v61 = vld [vmem:[%s4512_s5 + $0x218] sm:$0xff] }
 0x100   : > { %v696_v11 = vadd.f32 %v695_v1, %v594_v55  ;;  %v2661_v55 = vld [vmem:[%s4512_s5 + $0x230] sm:$0x3]  ;;  %v2623_v1 = vld [vmem:[%s4512_s5 + $0x140] sm:$0xff]  ;;  %v1095_v53 = vld [vmem:[%s4512_s5 + $0x98] sm:$0xff] }
 0x109   : > { %v805_v56 = vpop.f32.mrf.mxu0 }
 0x10a   : > { %v828_v28 = vadd.f32 %v805_v56, %v676_v22  ;;  %v2627_v56 = vld [vmem:[%s4512_s5 + $0x160] sm:$0xff] }
 0x10b   : > { %v807_v59 = vpop.f32.mrf.mxu0  ;;  %v2647_v22 = vld [vmem:[%s4512_s5 + $0x1c0] sm:$0xff] }
 0x10c   : > { %v829_v25 = vadd.f32 %v807_v59, %v678_v18  ;;  %v848_v33 = vadd.f32 %v841_v15, %v828_v28  ;;  %v2659_v59 = vld [vmem:[%s4512_s5 + $0x220] sm:$0xff]  ;;  %v2649_v18 = vld [vmem:[%s4512_s5 + $0x1d0] sm:$0xff]  ;;  %v2644_v28 = vld [vmem:[%s4512_s5 + $0x1a8] sm:$0xff] }
 0x10d   : > { %v811_v60 = vpop.f32.mrf.mxu0 }
 0x10e   : > { %v830_v23 = vadd.f32 %v811_v60, %v682_v14  ;;  %v849_v32 = vadd.f32 %v845_v19, %v829_v25  ;;  %v2625_v60 = vld [vmem:[%s4512_s5 + $0x150] sm:$0xff]  ;;  %v2651_v14 = vld [vmem:[%s4512_s5 + $0x1e0] sm:$0xff]  ;;  %v2612_v25 = vld [vmem:[%s4512_s5 + $0xe8] sm:$0xff] }
 0x10f   : > { %v813_v63 = vpop.f32.mrf.mxu0 }
 0x110   : > { %v831_v20 = vadd.f32 %v813_v63, %v684_v10  ;;  %v850_v31 = vadd.f32 %v841_v15, %v830_v23  ;;  %v2624_v63 = vld [vmem:[%s4512_s5 + $0x148] sm:$0xff]  ;;  %v2653_v10 = vld [vmem:[%s4512_s5 + $0x1f0] sm:$0xff] }
 0x111   : > { %v817_v0 = vpop.f32.mrf.mxu0  ;;  %v2613_v23 = vld [vmem:[%s4512_s5 + $0xf0] sm:$0xff] }
 0x112   : > { %v832_v16 = vadd.f32 %v817_v0, %v688_v8  ;;  %v851_v30 = vadd.f32 %v845_v19, %v831_v20  ;;  %v2657_v0 = vld [vmem:[%s4512_s5 + $0x210] sm:$0xff]  ;;  %v2654_v8 = vld [vmem:[%s4512_s5 + $0x1f8] sm:$0xff]  ;;  %v2648_v20 = vld [vmem:[%s4512_s5 + $0x1c8] sm:$0xff] }
 0x113   : > { %v819_v3 = vpop.f32.mrf.mxu0 }
 0x114   : > { %v833_v12 = vadd.f32 %v819_v3, %v690_v4  ;;  %v852_v29 = vadd.f32 %v841_v15, %v832_v16  ;;  %v2656_v3 = vld [vmem:[%s4512_s5 + $0x208] sm:$0xff]  ;;  %v2622_v4 = vld [vmem:[%s4512_s5 + $0x138] sm:$0xff] }
 0x115   : > { %v823_v9 = vpop.f32.mrf.mxu0  ;;  %v2650_v16 = vld [vmem:[%s4512_s5 + $0x1d8] sm:$0xff] }
 0x116   : > { %v834_v13 = vadd.f32 %v823_v9, %v694_v5  ;;  %v853_v26 = vadd.f32 %v845_v19, %v833_v12  ;;  %v2655_v5 = vld [vmem:[%s4512_s5 + $0x200] sm:$0xff]  ;;  %v2620_v9 = vld [vmem:[%s4512_s5 + $0x128] sm:$0xff] }
 0x117   : > { %v825_v17 = vpop.f32.mrf.mxu0  ;;  %v2652_v12 = vld [vmem:[%s4512_s5 + $0x1e8] sm:$0xff] }
 0x118   : > { %v835_v21 = vadd.f32 %v825_v17, %v696_v11  ;;  %v854_v24 = vadd.f32 %v841_v15, %v834_v13  ;;  %v2619_v11 = vld [vmem:[%s4512_s5 + $0x120] sm:$0xff]  ;;  %v2618_v13 = vld [vmem:[%s4512_s5 + $0x118] sm:$0xff]  ;;  %v2617_v15 = vld [vmem:[%s4512_s5 + $0x110] sm:$0xff] }
 0x119   : > { %v2616_v17 = vld [vmem:[%s4512_s5 + $0x108] sm:$0xff] }
 0x11a   : > { %v855_v27 = vadd.f32 %v845_v19, %v835_v21  ;;  %v2615_v19 = vld [vmem:[%s4512_s5 + $0x100] sm:$0xff]  ;;  %v2614_v21 = vld [vmem:[%s4512_s5 + $0xf8] sm:$0xff] }
 0x11c   : > { %2853 = vtanh.f32 %v855_v27  ;;  %v2611_v27 = vld [vmem:[%s4512_s5 + $0xe0] sm:$0xff] }
 0x11d   : > { %2855 = vtanh.f32 %v854_v24  ;;  %v2646_v24 = vld [vmem:[%s4512_s5 + $0x1b8] sm:$0xff] }
 0x11e   : > { %2857 = vtanh.f32 %v853_v26  ;;  %v2645_v26 = vld [vmem:[%s4512_s5 + $0x1b0] sm:$0xff] }
 0x11f   : > { %2859 = vtanh.f32 %v852_v29  ;;  %v2610_v29 = vld [vmem:[%s4512_s5 + $0xd8] sm:$0xff] }
 0x120   : > { %2861 = vtanh.f32 %v851_v30  ;;  %v2643_v30 = vld [vmem:[%s4512_s5 + $0x1a0] sm:$0xff] }
 0x121   : > { %2863 = vtanh.f32 %v850_v31  ;;  %v2609_v31 = vld [vmem:[%s4512_s5 + $0xd0] sm:$0xff] }
 0x122   : > { %2865 = vtanh.f32 %v849_v32  ;;  %v2642_v32 = vld [vmem:[%s4512_s5 + $0x198] sm:$0xff] }
 0x123   : > { %2867 = vtanh.f32 %v848_v33  ;;  %v2608_v33 = vld [vmem:[%s4512_s5 + $0xc8] sm:$0xff] }
 0x129   : > { %v2854_v34 = vpop.eup %2853 }
 0x12a   : > { %v2856_v35 = vpop.eup %2855  ;;  %2600 = vmatprep.subr.msk.mxu0 %vm873_vm2, %v2854_v34  ;;  %v2641_v34 = vld [vmem:[%s4512_s5 + $0x190] sm:$0xff] }
 0x12b   : > { %v2858_v36 = vpop.eup %2857  ;;  %2601 = vmatpush1.msk.msra.mxu0 %vm873_vm2, %v2856_v35  ;;  %v2607_v35 = vld [vmem:[%s4512_s5 + $0xc0] sm:$0xff] }
 0x12c   : > { %v2860_v37 = vpop.eup %2859  ;;  %906 = vmatprep.subr.mxu0 %v2858_v36  ;;  %v2640_v36 = vld [vmem:[%s4512_s5 + $0x188] sm:$0xff] }
 0x12d   : > { %v2862_v38 = vpop.eup %2861  ;;  %907 = vmatpush1.msra.mxu0 %v2860_v37  ;;  %v1099_v37 = vld [vmem:[%s4512_s5 + $0xb8] sm:$0x3] }
 0x12e   : > { %v2864_v39 = vpop.eup %2863  ;;  %908 = vmatprep.subr.mxu0 %v2862_v38  ;;  %v2639_v38 = vld [vmem:[%s4512_s5 + $0x180] sm:$0xff] }
 0x12f   : > { %v2866_v40 = vpop.eup %2865  ;;  %909 = vmatpush1.msra.mxu0 %v2864_v39 }
 0x130   : > { %v2868_v42 = vpop.eup %2867  ;;  %910 = vmatprep.subr.mxu0 %v2866_v40 }
 0x131   : > { %911 = vmatpush1.msra.mxu0 %v2868_v42 }
 0x132   : > { %2602 = vmatmul.mubr.msk.f32.vlgmr.msra.gmra.mxu0 %vm866_vm3, %v864_v41  ;;  %2631 = vmatprep.subr.msk.mxu0 %vm1133_vm5, %v2630_v51  ;;  %v1097_v51 = vld [vmem:[%s4512_s5 + $0xa8] sm:$0xff] }
 0x133   : > { %950 = vmatprep.mubr.f32.mxu0 %v2953_v50  ;;  %2632 = vmatpush1.msk.msra.mxu0 %vm1133_vm5, %v2629_v52  ;;  %v1096_v52 = vld [vmem:[%s4512_s5 + $0xa0] sm:$0xff] }
 0x134   : > { %1150 = vmatprep.subr.mxu0 %v2628_v54  ;;  %v1094_v54 = vld [vmem:[%s4512_s5 + $0x90] sm:$0xff] }
 0x135   : > { %1151 = vmatpush1.msra.mxu0 %v2627_v56  ;;  %v1093_v56 = vld [vmem:[%s4512_s5 + $0x88] sm:$0xff] }
 0x136   : > { %2603 = vmatmul.mubr.msk.f32.gmra.mxu0 %vm866_vm3, %v865_v43  ;;  %1152 = vmatprep.subr.mxu0 %v2626_v58  ;;  %v1092_v58 = vld [vmem:[%s4512_s5 + $0x80] sm:$0xff] }
 0x137   : > { %1204 = vmatprep.mubr.f32.mxu0 %v2953_v50  ;;  %1153 = vmatpush1.msra.mxu0 %v2625_v60  ;;  %v1090_v60 = vld [vmem:[%s4512_s5 + $0x70] sm:$0xff] }
 0x138   : > { %1154 = vmatprep.subr.mxu0 %v2624_v63  ;;  %v1088_v63 = vld [vmem:[%s4512_s5 + $0x60] sm:$0xff] }
 0x139   : > { %1155 = vmatpush1.msra.mxu0 %v2623_v1  ;;  %v1086_v1 = vld [vmem:[%s4512_s5 + $0x50] sm:$0xff] }
 0x13a   : > { %1156 = vmatprep.subr.mxu0 %v2622_v4  ;;  %v1084_v4 = vld [vmem:[%s4512_s5 + $0x40] sm:$0xff] }
 0x13b   : > { %1157 = vmatpush1.msra.mxu0 %v2621_v6  ;;  %v1082_v6 = vld [vmem:[%s4512_s5 + $0x30] sm:$0xff] }
 0x13c   : > { %1158 = vmatprep.subr.mxu0 %v2620_v9  ;;  %v1080_v9 = vld [vmem:[%s4512_s5 + $0x20] sm:$0xff] }
 0x13d   : > { %1159 = vmatpush1.msra.mxu0 %v2619_v11  ;;  %v1078_v11 = vld [vmem:[%s4512_s5 + $0x10] sm:$0xff] }
 0x13e   : > { %1160 = vmatprep.subr.mxu0 %v2618_v13  ;;  %v1076_v13 = vld [vmem:[%s4512_s5] sm:$0xff] }
 0x13f   : > { %1161 = vmatpush1.msra.mxu0 %v2617_v15 }
 0x140   : > { %1162 = vmatprep.subr.mxu0 %v2616_v17 }
 0x141   : > { %1163 = vmatpush1.msra.mxu0 %v2615_v19 }
 0x142   : > { %1164 = vmatprep.subr.mxu0 %v2614_v21 }
 0x143   : > { %1165 = vmatpush1.msra.mxu0 %v2613_v23 }
 0x144   : > { %1166 = vmatprep.subr.mxu0 %v2612_v25 }
 0x145   : > { %1167 = vmatpush1.msra.mxu0 %v2611_v27 }
 0x146   : > { %1168 = vmatprep.subr.mxu0 %v2610_v29 }
 0x147   : > { %1169 = vmatpush1.msra.mxu0 %v2609_v31 }
 0x148   : > { %1170 = vmatprep.subr.mxu0 %v2608_v33 }
 0x149   : > { %1171 = vmatpush1.msra.mxu0 %v2607_v35 }
 0x14a   : > { %2635 = vmatprep.subr.msk.mxu0 %vm1133_vm5, %v1099_v37 }
 0x1f2   : > { %v946_v46 = vpop.f32.mrf.mxu0 }
 0x1f4   : > { %v948_v47 = vpop.f32.mrf.mxu0 }
 0x1f5   : > { %2605 = vmatprep.mubr.msk.f32.mxu1 %vm980_vm4, %v948_v47  ;;  %v1098_v47 = vld [vmem:[%s4512_s5 + $0xb0] sm:$0x3] }
 0x1f6   : > { %v952_v48 = vpop.f32.mrf.mxu0  ;;  %1056 = vmatmul.mubr.f32.vlgmr.msra.gmra.mxu1 %v946_v46 }
 0x1f7   : > { %2664 = vmatpush1.msk.msra.mxu1 %vm1133_vm5, %v2661_v55 }
 0x1f8   : > { %v954_v49 = vpop.f32.mrf.mxu0  ;;  %1355 = vmatprep.subr.mxu1 %v2660_v57 }
 0x1f9   : > { %2606 = vmatprep.mubr.msk.f32.mxu1 %vm980_vm4, %v954_v49  ;;  %1356 = vmatpush1.msra.mxu1 %v2659_v59  ;;  %v1091_v59 = vld [vmem:[%s4512_s5 + $0x78] sm:$0xff] }
 0x1fa   : > { %1061 = vmatmul.mubr.f32.gmra.mxu1 %v952_v48  ;;  %1357 = vmatprep.subr.mxu1 %v2658_v61  ;;  %v1089_v61 = vld [vmem:[%s4512_s5 + $0x68] sm:$0xff] }
 0x1fb   : > { %1409 = vmatprep.mubr.f32.mxu1 %v2953_v50  ;;  %1358 = vmatpush1.msra.mxu1 %v2657_v0  ;;  %v1087_v0 = vld [vmem:[%s4512_s5 + $0x58] sm:$0xff] }
 0x1fc   : > { %1359 = vmatprep.subr.mxu1 %v2656_v3  ;;  %v1085_v3 = vld [vmem:[%s4512_s5 + $0x48] sm:$0xff] }
 0x1fd   : > { %1360 = vmatpush1.msra.mxu1 %v2655_v5  ;;  %v1083_v5 = vld [vmem:[%s4512_s5 + $0x38] sm:$0xff] }
 0x1fe   : > { %1361 = vmatprep.subr.mxu1 %v2654_v8  ;;  %v1081_v8 = vld [vmem:[%s4512_s5 + $0x28] sm:$0xff] }
 0x1ff   : > { %1362 = vmatpush1.msra.mxu1 %v2653_v10  ;;  %v1079_v10 = vld [vmem:[%s4512_s5 + $0x18] sm:$0xff] }
 0x200   : > { %1363 = vmatprep.subr.mxu1 %v2652_v12  ;;  %v1077_v12 = vld [vmem:[%s4512_s5 + $0x8] sm:$0xff] }
 0x201   : > { %1364 = vmatpush1.msra.mxu1 %v2651_v14 }
 0x202   : > { %1365 = vmatprep.subr.mxu1 %v2650_v16 }
 0x203   : > { %1366 = vmatpush1.msra.mxu1 %v2649_v18 }
 0x204   : > { %1367 = vmatprep.subr.mxu1 %v2648_v20 }
 0x205   : > { %1368 = vmatpush1.msra.mxu1 %v2647_v22 }
 0x206   : > { %1369 = vmatprep.subr.mxu1 %v2646_v24 }
 0x207   : > { %1370 = vmatpush1.msra.mxu1 %v2645_v26 }
 0x208   : > { %1371 = vmatprep.subr.mxu1 %v2644_v28  ;;  %v1426_v28 = vld [vmem:[%s4513_s6] sm:$0x3] }
 0x209   : > { %1372 = vmatpush1.msra.mxu1 %v2643_v30  ;;  %v1431_v37 = vrot.slane %v1426_v28, %v3426_v2 }
 0x20a   : > { %1373 = vmatprep.subr.mxu1 %v2642_v32  ;;  %v1435_v32 = vrot.slane %v1426_v28, %v3432_v7  ;;  %v2704_v28 = vld [vmem:[%s4516_s9 + $0x288] sm:$0xff] }
 0x20b   : > { %1374 = vmatpush1.msra.mxu1 %v2641_v34 }
 0x20c   : > { %1375 = vmatprep.subr.mxu1 %v2640_v36 }
 0x20d   : > { %1376 = vmatpush1.msra.mxu1 %v2639_v38 }
 0x2b6   : > { %v1057_v39 = vpop.f32.mrf.mxu1 }
 0x2b7   : > { %v1066_v40 = vmul.f32 0.25, %v1057_v39 }
 0x2b8   : > { %v1059_v41 = vpop.f32.mrf.mxu1 }
 0x2b9   : > { %2869 = vtanh.f32 %v1066_v40 }
 0x2ba   : > { %v1062_v42 = vpop.f32.mrf.mxu1 }
 0x2bb   : > { %v1067_v43 = vmul.f32 0.25, %v1062_v42 }
 0x2bc   : > { %v1064_v44 = vpop.f32.mrf.mxu1 }
 0x2bd   : > { %2871 = vtanh.f32 %v1067_v43 }
 0x2c6   : > { %v2870_v45 = vpop.eup %2869 }
 0x2c7   : > { %1071 = vst.msk [vmem:[#allocation2] sm:$0xff] %vm1070_vm6, %v2870_v45 }
 0x2ca   : > { %v2872_v46 = vpop.eup %2871 }
 0x2cb   : > { %1073 = vst.msk [vmem:[#allocation2 + $0x8] sm:$0x7f] %vm1072_vm7, %v2872_v46  ;;  %v1446_v46 = vld [vmem:[%s4514_s7] sm:$0x3f] }
 0x2ce   : > { %v1074_v14 = vld [vmem:[#allocation2] sm:$0xff] }
 0x2d2   : > { %v1100_v48 = vld [vmem:[#allocation2 + $0x1] sm:$0xff]  ;;  %v1101_v55 = vld [vmem:[#allocation2 + $0x9] sm:$0x1f] }
 0x2d3   : > { %v1306_v49 = vld [vmem:[#allocation2 + $0x2] sm:$0xff]  ;;  %2633 = vmatmul.mubr.msk.f32.vlgmr.msra.gmra.mxu0 %vm1070_vm6, %v1100_v48  ;;  %v1307_v57 = vld [vmem:[#allocation2 + $0xa] sm:$0x1f]  ;;  %v1544_v48 = vld [vmem:[%s4515_s8 + $0x78] sm:$0xff] }
 0x2d4   : > { %2665 = vmatmul.mubr.msk.f32.vlgmr.msra.gmra.mxu1 %vm1070_vm6, %v1306_v49  ;;  %2636 = vmatpush1.msk.msra.mxu0 %vm1133_vm5, %v1098_v47  ;;  %v1075_v15 = vld [vmem:[#allocation2 + $0x8] sm:$0x1f]  ;;  %v1543_v49 = vld [vmem:[%s4515_s8 + $0x70] sm:$0xff] }
 0x2d5   : > { %1210 = vmatprep.mubr.f32.mxu0 %v2953_v50  ;;  %1239 = vmatprep.subr.mxu0 %v1097_v51  ;;  %v1542_v51 = vld [vmem:[%s4515_s8 + $0x68] sm:$0xff] }
 0x2d6   : > { %1415 = vmatprep.mubr.f32.mxu1 %v2953_v50  ;;  %1240 = vmatpush1.msra.mxu0 %v1096_v52  ;;  %v1541_v52 = vld [vmem:[%s4515_s8 + $0x60] sm:$0xff] }
 0x2d7   : > { %1241 = vmatprep.subr.mxu0 %v1095_v53  ;;  %2634 = vmatmul.mubr.msk.f32.gmra.mxu0 %vm1070_vm6, %v1101_v55  ;;  %v1540_v53 = vld [vmem:[%s4515_s8 + $0x58] sm:$0xff]  ;;  %v1538_v55 = vld [vmem:[%s4515_s8 + $0x48] sm:$0xff] }
 0x2d8   : > { %1242 = vmatpush1.msra.mxu0 %v1094_v54  ;;  %2666 = vmatmul.mubr.msk.f32.gmra.mxu1 %vm1070_vm6, %v1307_v57  ;;  %v1539_v54 = vld [vmem:[%s4515_s8 + $0x50] sm:$0xff]  ;;  %v1536_v57 = vld [vmem:[%s4515_s8 + $0x38] sm:$0xff] }
 0x2d9   : > { %1243 = vmatprep.subr.mxu0 %v1093_v56  ;;  %1293 = vmatprep.mubr.f32.mxu0 %v2953_v50  ;;  %v1537_v56 = vld [vmem:[%s4515_s8 + $0x40] sm:$0xff] }
 0x2da   : > { %1244 = vmatpush1.msra.mxu0 %v1092_v58  ;;  %1799 = vmatprep.mubr.f32.mxu1 %v2953_v50  ;;  %v1535_v58 = vld [vmem:[%s4515_s8 + $0x30] sm:$0xff] }
 0x2db   : > { %1245 = vmatprep.subr.mxu0 %v1091_v59  ;;  %v1534_v59 = vld [vmem:[%s4515_s8 + $0x28] sm:$0xff] }
 0x2dc   : > { %1246 = vmatpush1.msra.mxu0 %v1090_v60  ;;  %v1533_v60 = vld [vmem:[%s4515_s8 + $0x20] sm:$0xff] }
 0x2dd   : > { %1247 = vmatprep.subr.mxu0 %v1089_v61  ;;  %v1532_v61 = vld [vmem:[%s4515_s8 + $0x18] sm:$0xff] }
 0x2de   : > { %1248 = vmatpush1.msra.mxu0 %v1088_v63  ;;  %v1531_v63 = vld [vmem:[%s4515_s8 + $0x10] sm:$0xff] }
 0x2df   : > { %1249 = vmatprep.subr.mxu0 %v1087_v0  ;;  %v1530_v0 = vld [vmem:[%s4515_s8 + $0x8] sm:$0xff] }
 0x2e0   : > { %1250 = vmatpush1.msra.mxu0 %v1086_v1  ;;  %v1529_v1 = vld [vmem:[%s4515_s8] sm:$0xff] }
 0x2e1   : > { %1251 = vmatprep.subr.mxu0 %v1085_v3  ;;  %v1554_v3 = vld [vmem:[%s4515_s8 + $0xc8] sm:$0xff] }
 0x2e2   : > { %1252 = vmatpush1.msra.mxu0 %v1084_v4  ;;  %v1553_v4 = vld [vmem:[%s4515_s8 + $0xc0] sm:$0xff] }
 0x2e3   : > { %1253 = vmatprep.subr.mxu0 %v1083_v5  ;;  %v1552_v5 = vld [vmem:[%s4515_s8 + $0xb8] sm:$0xff] }
 0x2e4   : > { %1254 = vmatpush1.msra.mxu0 %v1082_v6  ;;  %v1551_v6 = vld [vmem:[%s4515_s8 + $0xb0] sm:$0xff] }
 0x2e5   : > { %1255 = vmatprep.subr.mxu0 %v1081_v8  ;;  %v1550_v8 = vld [vmem:[%s4515_s8 + $0xa8] sm:$0xff] }
 0x2e6   : > { %1256 = vmatpush1.msra.mxu0 %v1080_v9  ;;  %v1549_v9 = vld [vmem:[%s4515_s8 + $0xa0] sm:$0xff] }
 0x2e7   : > { %1257 = vmatprep.subr.mxu0 %v1079_v10  ;;  %v1548_v10 = vld [vmem:[%s4515_s8 + $0x98] sm:$0xff] }
 0x2e8   : > { %1258 = vmatpush1.msra.mxu0 %v1078_v11  ;;  %v1547_v11 = vld [vmem:[%s4515_s8 + $0x90] sm:$0xff] }
 0x2e9   : > { %1259 = vmatprep.subr.mxu0 %v1077_v12  ;;  %v1546_v12 = vld [vmem:[%s4515_s8 + $0x88] sm:$0xff] }
 0x2ea   : > { %1260 = vmatpush1.msra.mxu0 %v1076_v13  ;;  %v1545_v13 = vld [vmem:[%s4515_s8 + $0x80] sm:$0xff] }
 0x2eb   : > { %2637 = vmatmul.mubr.msk.f32.vlgmr.msra.gmra.mxu0 %vm1070_vm6, %v1074_v14 }
 0x2ec   : > { %1299 = vmatprep.mubr.f32.mxu0 %v2953_v50 }
 0x2ef   : > { %2638 = vmatmul.mubr.msk.f32.gmra.mxu0 %vm1070_vm6, %v1075_v15 }
 0x2f0   : > { %1522 = vmatprep.mubr.f32.mxu0 %v2953_v50 }
 0x393   : > { %v1206_v16 = vpop.f32.mrf.mxu0 }
 0x394   : > { %v1411_v19 = vpop.f32.mrf.mxu1 }
 0x395   : > { %v1208_v17 = vpop.f32.mrf.mxu0 }
 0x396   : > { %v1413_v21 = vpop.f32.mrf.mxu1 }
 0x397   : > { %v1212_v18 = vpop.f32.mrf.mxu0 }
 0x398   : > { %v1417_v25 = vpop.f32.mrf.mxu1 }
 0x399   : > { %v1214_v20 = vpop.f32.mrf.mxu0 }
 0x39a   : > { %v1419_v35 = vpop.f32.mrf.mxu1 }
 0x3ab   : > { %v1295_v22 = vpop.f32.mrf.mxu0 }
 0x3ac   : > { %v1296_v26 = vadd.f32 %v1295_v22, %v1206_v16  ;;  %v2716_v16 = vld [vmem:[%s4516_s9 + $0x2e8] sm:$0xff]  ;;  %v2711_v22 = vld [vmem:[%s4516_s9 + $0x2c0] sm:$0xff] }
 0x3ad   : > { %v1297_v23 = vpop.f32.mrf.mxu0  ;;  %1743 = vmatprep.subr.mxu1 %v2716_v16  ;;  %v2713_v16 = vld [vmem:[%s4516_s9 + $0x2d0] sm:$0xff] }
 0x3ae   : > { %v1298_v24 = vadd.f32 %v1297_v23, %v1208_v17  ;;  %v1422_v36 = vadd.f32 %v1411_v19, %v1296_v26  ;;  %v1679_v17 = vld [vmem:[%s4516_s9 + $0x168] sm:$0xff]  ;;  %v1678_v19 = vld [vmem:[%s4516_s9 + $0x160] sm:$0xff] }
 0x3af   : > { %v1301_v27 = vpop.f32.mrf.mxu0  ;;  %v1674_v23 = vld [vmem:[%s4516_s9 + $0x140] sm:$0xff] }
 0x3b0   : > { %v1302_v29 = vadd.f32 %v1301_v27, %v1212_v18  ;;  %v1423_v31 = vadd.f32 %v1413_v21, %v1298_v24  ;;  %v1438_v42 = vadd.f32 %v1431_v37, %v1422_v36  ;;  %v2715_v18 = vld [vmem:[%s4516_s9 + $0x2e0] sm:$0xff]  ;;  %v1675_v21 = vld [vmem:[%s4516_s9 + $0x148] sm:$0xff] }
 0x3b1   : > { %v1303_v30 = vpop.f32.mrf.mxu0  ;;  %1744 = vmatpush1.msra.mxu1 %v2715_v18  ;;  %v2708_v24 = vld [vmem:[%s4516_s9 + $0x2a8] sm:$0xff]  ;;  %v2707_v26 = vld [vmem:[%s4516_s9 + $0x2a0] sm:$0xff]  ;;  %v2710_v18 = vld [vmem:[%s4516_s9 + $0x2b8] sm:$0xff] }
 0x3b2   : > { %v1424_v33 = vadd.f32 %v1417_v25, %v1302_v29  ;;  %v1304_v34 = vadd.f32 %v1303_v30, %v1214_v20  ;;  %v1439_v40 = vadd.f32 %v1435_v32, %v1423_v31  ;;  %v2712_v20 = vld [vmem:[%s4516_s9 + $0x2c8] sm:$0xff]  ;;  %v1670_v27 = vld [vmem:[%s4516_s9 + $0x120] sm:$0xff] }
 0x3b3   : > { %1745 = vmatprep.subr.mxu1 %v2712_v20  ;;  %v1671_v25 = vld [vmem:[%s4516_s9 + $0x128] sm:$0xff]  ;;  %v2703_v30 = vld [vmem:[%s4516_s9 + $0x280] sm:$0xff]  ;;  %v2709_v20 = vld [vmem:[%s4516_s9 + $0x2b0] sm:$0xff] }
 0x3b4   : > { %v1425_v38 = vadd.f32 %v1419_v35, %v1304_v34  ;;  %v1440_v39 = vadd.f32 %v1431_v37, %v1424_v33  ;;  %1746 = vmatpush1.msra.mxu1 %v2711_v22  ;;  %v1667_v29 = vld [vmem:[%s4516_s9 + $0x108] sm:$0xff]  ;;  %v1666_v31 = vld [vmem:[%s4516_s9 + $0x100] sm:$0xff]  ;;  %v2706_v22 = vld [vmem:[%s4516_s9 + $0x298] sm:$0xff] }
 0x3b5   : > { %1747 = vmatprep.subr.mxu1 %v2708_v24  ;;  %v1663_v33 = vld [vmem:[%s4516_s9 + $0xe8] sm:$0xff]  ;;  %v2699_v34 = vld [vmem:[%s4516_s9 + $0x260] sm:$0xff]  ;;  %v2705_v24 = vld [vmem:[%s4516_s9 + $0x290] sm:$0xff] }
 0x3b6   : > { %v1441_v41 = vadd.f32 %v1435_v32, %v1425_v38  ;;  %1748 = vmatpush1.msra.mxu1 %v2707_v26  ;;  %v2700_v32 = vld [vmem:[%s4516_s9 + $0x268] sm:$0xff]  ;;  %v1662_v35 = vld [vmem:[%s4516_s9 + $0xe0] sm:$0xff]  ;;  %v2702_v26 = vld [vmem:[%s4516_s9 + $0x278] sm:$0xff] }
 0x3b7   : > { %1749 = vmatprep.subr.mxu1 %v2704_v28  ;;  %v2696_v36 = vld [vmem:[%s4516_s9 + $0x248] sm:$0xff]  ;;  %v2695_v38 = vld [vmem:[%s4516_s9 + $0x240] sm:$0xff]  ;;  %v2701_v28 = vld [vmem:[%s4516_s9 + $0x270] sm:$0xff] }
 0x3b8   : > { %2873 = vtanh.f32 %v1441_v41  ;;  %1750 = vmatpush1.msra.mxu1 %v2703_v30  ;;  %v1659_v37 = vld [vmem:[%s4516_s9 + $0xc8] sm:$0xff]  ;;  %v2698_v30 = vld [vmem:[%s4516_s9 + $0x258] sm:$0xff] }
 0x3b9   : > { %2875 = vtanh.f32 %v1440_v39  ;;  %1751 = vmatprep.subr.mxu1 %v2700_v32  ;;  %v1658_v39 = vld [vmem:[%s4516_s9 + $0xc0] sm:$0xff]  ;;  %v1655_v41 = vld [vmem:[%s4516_s9 + $0xa8] sm:$0xff]  ;;  %v2697_v32 = vld [vmem:[%s4516_s9 + $0x250] sm:$0xff] }
 0x3ba   : > { %2877 = vtanh.f32 %v1439_v40  ;;  %1752 = vmatpush1.msra.mxu1 %v2699_v34  ;;  %v2692_v40 = vld [vmem:[%s4516_s9 + $0x228] sm:$0xff]  ;;  %v2694_v34 = vld [vmem:[%s4516_s9 + $0x238] sm:$0xff] }
 0x3bb   : > { %2879 = vtanh.f32 %v1438_v42  ;;  %1753 = vmatprep.subr.mxu1 %v2696_v36  ;;  %v2691_v42 = vld [vmem:[%s4516_s9 + $0x220] sm:$0xff]  ;;  %v2693_v36 = vld [vmem:[%s4516_s9 + $0x230] sm:$0xff] }
 0x3bc   : > { %1754 = vmatpush1.msra.mxu1 %v2695_v38  ;;  %v2690_v38 = vld [vmem:[%s4516_s9 + $0x218] sm:$0xff] }
 0x3bd   : > { %1755 = vmatprep.subr.mxu1 %v2692_v40  ;;  %v2689_v40 = vld [vmem:[%s4516_s9 + $0x210] sm:$0xff] }
 0x3be   : > { %1756 = vmatpush1.msra.mxu1 %v2691_v42  ;;  %v2686_v42 = vld [vmem:[%s4516_s9 + $0x1f8] sm:$0xff] }
 0x3c5   : > { %v2874_v43 = vpop.eup %2873 }
 0x3c6   : > { %v2876_v44 = vpop.eup %2875  ;;  %2667 = vmatprep.subr.msk.mxu0 %vm1451_vm8, %v2874_v43  ;;  %v1654_v43 = vld [vmem:[%s4516_s9 + $0xa0] sm:$0xff] }
 0x3c7   : > { %v2878_v45 = vpop.eup %2877  ;;  %2668 = vmatpush1.msk.msra.mxu0 %vm1451_vm8, %v2876_v44  ;;  %v2688_v44 = vld [vmem:[%s4516_s9 + $0x208] sm:$0xff] }
 0x3c8   : > { %v2880_v47 = vpop.eup %2879  ;;  %1488 = vmatprep.subr.mxu0 %v2878_v45  ;;  %v1651_v45 = vld [vmem:[%s4516_s9 + $0x88] sm:$0xff]  ;;  %1757 = vmatprep.subr.mxu1 %v2688_v44  ;;  %v2685_v44 = vld [vmem:[%s4516_s9 + $0x1f0] sm:$0xff] }
 0x3c9   : > { %1489 = vmatpush1.msra.mxu0 %v2880_v47  ;;  %v1650_v47 = vld [vmem:[%s4516_s9 + $0x80] sm:$0xff] }
 0x3ca   : > { %2669 = vmatmul.mubr.msk.f32.vlgmr.msra.gmra.mxu0 %vm1447_vm9, %v1446_v46  ;;  %1559 = vmatprep.subr.mxu0 %v2953_v50  ;;  %v2687_v46 = vld [vmem:[%s4516_s9 + $0x200] sm:$0xff] }
 0x3cb   : > { %1560 = vmatpush1.msra.mxu0 %v1544_v48  ;;  %1758 = vmatpush1.msra.mxu1 %v2687_v46  ;;  %v2684_v48 = vld [vmem:[%s4516_s9 + $0x1e8] sm:$0xff]  ;;  %v2682_v46 = vld [vmem:[%s4516_s9 + $0x1d8] sm:$0xff] }
 0x3cc   : > { %1561 = vmatprep.subr.mxu0 %v2953_v50  ;;  %1759 = vmatprep.subr.mxu1 %v2684_v48  ;;  %v2681_v48 = vld [vmem:[%s4516_s9 + $0x1d0] sm:$0xff] }
 0x3cd   : > { %1562 = vmatpush1.msra.mxu0 %v1543_v49  ;;  %v1647_v49 = vld [vmem:[%s4516_s9 + $0x68] sm:$0xff] }
 0x3ce   : > { %1563 = vmatprep.subr.mxu0 %v2953_v50 }
 0x3cf   : > { %1564 = vmatpush1.msra.mxu0 %v1542_v51  ;;  %v2683_v51 = vld [vmem:[%s4516_s9 + $0x1e0] sm:$0xff] }
 0x3d0   : > { %1565 = vmatprep.subr.mxu0 %v2953_v50  ;;  %1760 = vmatpush1.msra.mxu1 %v2683_v51  ;;  %v2678_v51 = vld [vmem:[%s4516_s9 + $0x1b8] sm:$0xff] }
 0x3d1   : > { %1566 = vmatpush1.msra.mxu0 %v1541_v52  ;;  %v1646_v52 = vld [vmem:[%s4516_s9 + $0x60] sm:$0xff] }
 0x3d2   : > { %1567 = vmatprep.subr.mxu0 %v2953_v50 }
 0x3d3   : > { %1568 = vmatpush1.msra.mxu0 %v1540_v53  ;;  %v2680_v53 = vld [vmem:[%s4516_s9 + $0x1c8] sm:$0xff] }
 0x3d4   : > { %1569 = vmatprep.subr.mxu0 %v2953_v50  ;;  %1761 = vmatprep.subr.mxu1 %v2680_v53  ;;  %v2677_v53 = vld [vmem:[%s4516_s9 + $0x1b0] sm:$0xff] }
 0x3d5   : > { %1570 = vmatpush1.msra.mxu0 %v1539_v54  ;;  %v1643_v54 = vld [vmem:[%s4516_s9 + $0x48] sm:$0xff] }
 0x3d6   : > { %1571 = vmatprep.subr.mxu0 %v2953_v50 }
 0x3d7   : > { %1572 = vmatpush1.msra.mxu0 %v1538_v55  ;;  %v2679_v55 = vld [vmem:[%s4516_s9 + $0x1c0] sm:$0xff] }
 0x3d8   : > { %1573 = vmatprep.subr.mxu0 %v2953_v50  ;;  %1762 = vmatpush1.msra.mxu1 %v2679_v55  ;;  %v2674_v55 = vld [vmem:[%s4516_s9 + $0x198] sm:$0xff] }
 0x3d9   : > { %1574 = vmatpush1.msra.mxu0 %v1537_v56  ;;  %v1642_v56 = vld [vmem:[%s4516_s9 + $0x40] sm:$0xff] }
 0x3da   : > { %1575 = vmatprep.subr.mxu0 %v2953_v50 }
 0x3db   : > { %1576 = vmatpush1.msra.mxu0 %v1536_v57  ;;  %v2676_v57 = vld [vmem:[%s4516_s9 + $0x1a8] sm:$0xff] }
 0x3dc   : > { %1577 = vmatprep.subr.mxu0 %v2953_v50  ;;  %1763 = vmatprep.subr.mxu1 %v2676_v57  ;;  %v2673_v57 = vld [vmem:[%s4516_s9 + $0x190] sm:$0xff] }
 0x3dd   : > { %1578 = vmatpush1.msra.mxu0 %v1535_v58  ;;  %v1639_v58 = vld [vmem:[%s4516_s9 + $0x28] sm:$0xff] }
 0x3de   : > { %1579 = vmatprep.subr.mxu0 %v2953_v50 }
 0x3df   : > { %1580 = vmatpush1.msra.mxu0 %v1534_v59  ;;  %v2675_v59 = vld [vmem:[%s4516_s9 + $0x1a0] sm:$0xff] }
 0x3e0   : > { %1581 = vmatprep.subr.mxu0 %v2953_v50  ;;  %1764 = vmatpush1.msra.mxu1 %v2675_v59  ;;  %v1681_v59 = vld [vmem:[%s4516_s9 + $0x178] sm:$0xff] }
 0x3e1   : > { %1582 = vmatpush1.msra.mxu0 %v1533_v60  ;;  %v1638_v60 = vld [vmem:[%s4516_s9 + $0x20] sm:$0xff] }
 0x3e2   : > { %1583 = vmatprep.subr.mxu0 %v2953_v50 }
 0x3e3   : > { %1584 = vmatpush1.msra.mxu0 %v1532_v61  ;;  %v2672_v61 = vld [vmem:[%s4516_s9 + $0x188] sm:$0xff] }
 0x3e4   : > { %1585 = vmatprep.subr.mxu0 %v2953_v50  ;;  %1765 = vmatprep.subr.mxu1 %v2672_v61  ;;  %v1677_v61 = vld [vmem:[%s4516_s9 + $0x158] sm:$0xff] }
 0x3e5   : > { %1586 = vmatpush1.msra.mxu0 %v1531_v63  ;;  %v1635_v63 = vld [vmem:[%s4516_s9 + $0x8] sm:$0xff] }
 0x3e6   : > { %1587 = vmatprep.subr.mxu0 %v2953_v50 }
 0x3e7   : > { %1588 = vmatpush1.msra.mxu0 %v1530_v0  ;;  %v2671_v0 = vld [vmem:[%s4516_s9 + $0x180] sm:$0xff] }
 0x3e8   : > { %1589 = vmatprep.subr.mxu0 %v2953_v50  ;;  %1766 = vmatpush1.msra.mxu1 %v2671_v0  ;;  %v1676_v0 = vld [vmem:[%s4516_s9 + $0x150] sm:$0xff] }
 0x3e9   : > { %1590 = vmatpush1.msra.mxu0 %v1529_v1  ;;  %v1634_v1 = vld [vmem:[%s4516_s9] sm:$0xff] }
 0x3ea   : > { %1603 = vmatprep.subr.mxu0 %v2953_v50 }
 0x3eb   : > { %1604 = vmatpush2.msra.mxu0 %v1554_v3  ;;  %v2718_v3 = vld [vmem:[%s4516_s9 + $0x2f8] sm:$0xff] }
 0x3ec   : > { %1605 = vmatprep.subr.mxu0 %v2953_v50  ;;  %1814 = vmatprep.subr.mxu1 %v2718_v3  ;;  %v1672_v3 = vld [vmem:[%s4516_s9 + $0x130] sm:$0xff] }
 0x3ed   : > { %1606 = vmatpush2.msra.mxu0 %v1553_v4  ;;  %v2768_v4 = vld [vmem:[%s4516_s9 + $0x468] sm:$0xff] }
 0x3ee   : > { %1607 = vmatprep.subr.mxu0 %v2953_v50 }
 0x3ef   : > { %1608 = vmatpush2.msra.mxu0 %v1552_v5 }
 0x3f0   : > { %1609 = vmatprep.subr.mxu0 %v2953_v50 }
 0x3f1   : > { %1610 = vmatpush2.msra.mxu0 %v1551_v6 }
 0x3f2   : > { %1611 = vmatprep.subr.mxu0 %v2953_v50 }
 0x3f3   : > { %1612 = vmatpush2.msra.mxu0 %v1550_v8 }
 0x3f4   : > { %1613 = vmatprep.subr.mxu0 %v2953_v50 }
 0x3f5   : > { %1614 = vmatpush2.msra.mxu0 %v1549_v9 }
 0x3f6   : > { %1615 = vmatprep.subr.mxu0 %v2953_v50 }
 0x3f7   : > { %1616 = vmatpush2.msra.mxu0 %v1548_v10  ;;  %v2717_v10 = vld [vmem:[%s4516_s9 + $0x2f0] sm:$0xff] }
 0x3f8   : > { %1617 = vmatprep.subr.mxu0 %v2953_v50 }
 0x3f9   : > { %1618 = vmatpush2.msra.mxu0 %v1547_v11  ;;  %v2767_v11 = vld [vmem:[%s4516_s9 + $0x460] sm:$0xff] }
 0x3fa   : > { %1619 = vmatprep.subr.mxu0 %v2953_v50 }
 0x3fb   : > { %1620 = vmatpush2.msra.mxu0 %v1546_v12  ;;  %v2714_v12 = vld [vmem:[%s4516_s9 + $0x2d8] sm:$0xff] }
 0x3fc   : > { %1621 = vmatprep.subr.mxu0 %v2953_v50 }
 0x3fd   : > { %1622 = vmatpush2.msra.mxu0 %v1545_v13 }
 0x3fe   : > { %1888 = vmatprep.subr.mxu0 %v1679_v17  ;;  %v2763_v17 = vld [vmem:[%s4516_s9 + $0x440] sm:$0xff] }
 0x48a   : > { %v1524_v14 = vpop.f32.mrf.mxu0 }
 0x48c   : > { %v1526_v15 = vpop.f32.mrf.mxu0 }
 0x48d   : > { %2670 = vmatprep.mubr.msk.f32.mxu0 %vm1555_vm10, %v1526_v15  ;;  %v2764_v15 = vld [vmem:[%s4516_s9 + $0x448] sm:$0xff] }
 0x48e   : > { %1624 = vmatmul.mubr.f32.vlgmr.msra.gmra.mxu0 %v1524_v14 }
 0x48f   : > { %1944 = vmatprep.mubr.f32.mxu0 %v2953_v50  ;;  %1889 = vmatpush1.msra.mxu0 %v1678_v19  ;;  %v2760_v19 = vld [vmem:[%s4516_s9 + $0x428] sm:$0xff] }
 0x490   : > { %1890 = vmatprep.subr.mxu0 %v1675_v21  ;;  %v2759_v21 = vld [vmem:[%s4516_s9 + $0x420] sm:$0xff] }
 0x491   : > { %1891 = vmatpush1.msra.mxu0 %v1674_v23  ;;  %v2756_v23 = vld [vmem:[%s4516_s9 + $0x408] sm:$0xff] }
 0x492   : > { %1892 = vmatprep.subr.mxu0 %v1671_v25  ;;  %v2755_v25 = vld [vmem:[%s4516_s9 + $0x400] sm:$0xff] }
 0x493   : > { %1893 = vmatpush1.msra.mxu0 %v1670_v27  ;;  %v2752_v27 = vld [vmem:[%s4516_s9 + $0x3e8] sm:$0xff] }
 0x494   : > { %1894 = vmatprep.subr.mxu0 %v1667_v29  ;;  %v2751_v29 = vld [vmem:[%s4516_s9 + $0x3e0] sm:$0xff] }
 0x495   : > { %1895 = vmatpush1.msra.mxu0 %v1666_v31  ;;  %v2748_v31 = vld [vmem:[%s4516_s9 + $0x3c8] sm:$0xff] }
 0x496   : > { %1896 = vmatprep.subr.mxu0 %v1663_v33  ;;  %v2747_v33 = vld [vmem:[%s4516_s9 + $0x3c0] sm:$0xff] }
 0x497   : > { %1897 = vmatpush1.msra.mxu0 %v1662_v35  ;;  %v2744_v35 = vld [vmem:[%s4516_s9 + $0x3a8] sm:$0xff] }
 0x498   : > { %1898 = vmatprep.subr.mxu0 %v1659_v37  ;;  %v2743_v37 = vld [vmem:[%s4516_s9 + $0x3a0] sm:$0xff] }
 0x499   : > { %1899 = vmatpush1.msra.mxu0 %v1658_v39  ;;  %v2740_v39 = vld [vmem:[%s4516_s9 + $0x388] sm:$0xff] }
 0x49a   : > { %1900 = vmatprep.subr.mxu0 %v1655_v41  ;;  %v2739_v41 = vld [vmem:[%s4516_s9 + $0x380] sm:$0xff] }
 0x49b   : > { %1901 = vmatpush1.msra.mxu0 %v1654_v43  ;;  %v2736_v43 = vld [vmem:[%s4516_s9 + $0x368] sm:$0xff] }
 0x49c   : > { %1902 = vmatprep.subr.mxu0 %v1651_v45  ;;  %v2735_v45 = vld [vmem:[%s4516_s9 + $0x360] sm:$0xff] }
 0x49d   : > { %1903 = vmatpush1.msra.mxu0 %v1650_v47  ;;  %v2732_v47 = vld [vmem:[%s4516_s9 + $0x348] sm:$0xff] }
 0x49e   : > { %1904 = vmatprep.subr.mxu0 %v1647_v49  ;;  %v2731_v49 = vld [vmem:[%s4516_s9 + $0x340] sm:$0xff] }
 0x49f   : > { %1905 = vmatpush1.msra.mxu0 %v1646_v52  ;;  %v2728_v52 = vld [vmem:[%s4516_s9 + $0x328] sm:$0xff] }
 0x4a0   : > { %1906 = vmatprep.subr.mxu0 %v1643_v54  ;;  %v2727_v54 = vld [vmem:[%s4516_s9 + $0x320] sm:$0xff] }
 0x4a1   : > { %1907 = vmatpush1.msra.mxu0 %v1642_v56  ;;  %v2724_v56 = vld [vmem:[%s4516_s9 + $0x308] sm:$0xff] }
 0x4a2   : > { %1908 = vmatprep.subr.mxu0 %v1639_v58  ;;  %v2723_v58 = vld [vmem:[%s4516_s9 + $0x300] sm:$0xff] }
 0x4a3   : > { %1909 = vmatpush1.msra.mxu0 %v1638_v60  ;;  %v1680_v60 = vld [vmem:[%s4516_s9 + $0x170] sm:$0xff] }
 0x4a4   : > { %1910 = vmatprep.subr.mxu0 %v1635_v63 }
 0x4a5   : > { %1911 = vmatpush1.msra.mxu0 %v1634_v1  ;;  %v1673_v1 = vld [vmem:[%s4516_s9 + $0x138] sm:$0xff] }
 0x4a6   : > { %2083 = vmatprep.subr.mxu0 %v2768_v4  ;;  %v1669_v4 = vld [vmem:[%s4516_s9 + $0x118] sm:$0xff] }
 0x54e   : > { %v1625_v5 = vpop.f32.mrf.mxu0 }
 0x54f   : > { %v1629_v6 = vmul.f32 0.25, %v1625_v5  ;;  %v1668_v5 = vld [vmem:[%s4516_s9 + $0x110] sm:$0xff] }
 0x550   : > { %v1627_v8 = vpop.f32.mrf.mxu0 }
 0x551   : > { %2881 = vtanh.f32 %v1629_v6  ;;  %v1665_v6 = vld [vmem:[%s4516_s9 + $0xf8] sm:$0xff]  ;;  %v1664_v8 = vld [vmem:[%s4516_s9 + $0xf0] sm:$0xff] }
 0x55e   : > { %v2882_v9 = vpop.eup %2881 }
 0x55f   : > { %1632 = vst.msk [vmem:[#allocation3] sm:$0x3f] %vm1631_vm11, %v2882_v9  ;;  %v1661_v9 = vld [vmem:[%s4516_s9 + $0xd8] sm:$0xff] }
 0x566   : > { %v3959_v13 = vld [vmem:[#allocation3 + $0x1] sm:$0xf] }
 0x567   : > { %v3961_v14 = vld [vmem:[#allocation3] sm:$0xf]  ;;  %2719 = vmatmul.mubr.msk.f32.vlgmr.msra.gmra.mxu1 %vm495_vm0, %v3959_v13 }
 0x568   : > { %2721 = vmatmul.mubr.msk.f32.vlgmr.msra.gmra.mxu0 %vm495_vm0, %v3961_v14  ;;  %1815 = vmatpush1.msra.mxu1 %v2717_v10  ;;  %v4109_v63 = vld [vmem:[#allocation3 + $0x2] sm:$0xf] }
 0x569   : > { %2084 = vmatpush1.msra.mxu0 %v2767_v11  ;;  %1816 = vmatprep.subr.mxu1 %v2714_v12  ;;  %v1660_v10 = vld [vmem:[%s4516_s9 + $0xd0] sm:$0xff]  ;;  %v1657_v11 = vld [vmem:[%s4516_s9 + $0xb8] sm:$0xff] }
 0x56a   : > { %2085 = vmatprep.subr.mxu0 %v2764_v15  ;;  %1817 = vmatpush1.msra.mxu1 %v2713_v16  ;;  %v1656_v12 = vld [vmem:[%s4516_s9 + $0xb0] sm:$0xff]  ;;  %v1649_v16 = vld [vmem:[%s4516_s9 + $0x78] sm:$0xff] }
 0x56b   : > { %2086 = vmatpush1.msra.mxu0 %v2763_v17  ;;  %1818 = vmatprep.subr.mxu1 %v2710_v18  ;;  %v1652_v15 = vld [vmem:[%s4516_s9 + $0x90] sm:$0xff]  ;;  %v1645_v18 = vld [vmem:[%s4516_s9 + $0x58] sm:$0xff] }
 0x56c   : > { %2087 = vmatprep.subr.mxu0 %v2760_v19  ;;  %1819 = vmatpush1.msra.mxu1 %v2709_v20  ;;  %v1648_v17 = vld [vmem:[%s4516_s9 + $0x70] sm:$0xff]  ;;  %v1641_v20 = vld [vmem:[%s4516_s9 + $0x38] sm:$0xff] }
 0x56d   : > { %2088 = vmatpush1.msra.mxu0 %v2759_v21  ;;  %1820 = vmatprep.subr.mxu1 %v2706_v22  ;;  %v1644_v19 = vld [vmem:[%s4516_s9 + $0x50] sm:$0xff]  ;;  %v1637_v22 = vld [vmem:[%s4516_s9 + $0x18] sm:$0xff] }
 0x56e   : > { %2089 = vmatprep.subr.mxu0 %v2756_v23  ;;  %1821 = vmatpush1.msra.mxu1 %v2705_v24  ;;  %v1640_v21 = vld [vmem:[%s4516_s9 + $0x30] sm:$0xff]  ;;  %v2770_v24 = vld [vmem:[%s4516_s9 + $0x478] sm:$0xff] }
 0x56f   : > { %2090 = vmatpush1.msra.mxu0 %v2755_v25  ;;  %1822 = vmatprep.subr.mxu1 %v2702_v26  ;;  %v1636_v23 = vld [vmem:[%s4516_s9 + $0x10] sm:$0xff]  ;;  %v2766_v26 = vld [vmem:[%s4516_s9 + $0x458] sm:$0xff] }
 0x570   : > { %2091 = vmatprep.subr.mxu0 %v2752_v27  ;;  %1823 = vmatpush1.msra.mxu1 %v2701_v28  ;;  %v2769_v25 = vld [vmem:[%s4516_s9 + $0x470] sm:$0xff]  ;;  %v2762_v28 = vld [vmem:[%s4516_s9 + $0x438] sm:$0xff] }
 0x571   : > { %2092 = vmatpush1.msra.mxu0 %v2751_v29  ;;  %1824 = vmatprep.subr.mxu1 %v2698_v30  ;;  %v2765_v27 = vld [vmem:[%s4516_s9 + $0x450] sm:$0xff] }
 0x572   : > { %2093 = vmatprep.subr.mxu0 %v2748_v31  ;;  %1825 = vmatpush1.msra.mxu1 %v2697_v32  ;;  %v2761_v29 = vld [vmem:[%s4516_s9 + $0x430] sm:$0xff]  ;;  %v2754_v31 = vld [vmem:[%s4516_s9 + $0x3f8] sm:$0xff] }
 0x573   : > { %2094 = vmatpush1.msra.mxu0 %v2747_v33  ;;  %1826 = vmatprep.subr.mxu1 %v2694_v34  ;;  %v2757_v30 = vld [vmem:[%s4516_s9 + $0x410] sm:$0xff]  ;;  %v2750_v33 = vld [vmem:[%s4516_s9 + $0x3d8] sm:$0xff] }
 0x574   : > { %2095 = vmatprep.subr.mxu0 %v2744_v35  ;;  %1827 = vmatpush1.msra.mxu1 %v2693_v36  ;;  %v2753_v32 = vld [vmem:[%s4516_s9 + $0x3f0] sm:$0xff]  ;;  %v2746_v35 = vld [vmem:[%s4516_s9 + $0x3b8] sm:$0xff] }
 0x575   : > { %2096 = vmatpush1.msra.mxu0 %v2743_v37  ;;  %1828 = vmatprep.subr.mxu1 %v2690_v38  ;;  %v2749_v34 = vld [vmem:[%s4516_s9 + $0x3d0] sm:$0xff]  ;;  %v2742_v37 = vld [vmem:[%s4516_s9 + $0x398] sm:$0xff] }
 0x576   : > { %2097 = vmatprep.subr.mxu0 %v2740_v39  ;;  %1829 = vmatpush1.msra.mxu1 %v2689_v40  ;;  %v2745_v36 = vld [vmem:[%s4516_s9 + $0x3b0] sm:$0xff]  ;;  %v2738_v39 = vld [vmem:[%s4516_s9 + $0x378] sm:$0xff] }
 0x577   : > { %2098 = vmatpush1.msra.mxu0 %v2739_v41  ;;  %1830 = vmatprep.subr.mxu1 %v2686_v42  ;;  %v2741_v38 = vld [vmem:[%s4516_s9 + $0x390] sm:$0xff]  ;;  %v2734_v41 = vld [vmem:[%s4516_s9 + $0x358] sm:$0xff] }
 0x578   : > { %2099 = vmatprep.subr.mxu0 %v2736_v43  ;;  %1831 = vmatpush1.msra.mxu1 %v2685_v44  ;;  %v2737_v40 = vld [vmem:[%s4516_s9 + $0x370] sm:$0xff]  ;;  %v2730_v43 = vld [vmem:[%s4516_s9 + $0x338] sm:$0xff] }
 0x579   : > { %2100 = vmatpush1.msra.mxu0 %v2735_v45  ;;  %1832 = vmatprep.subr.mxu1 %v2682_v46  ;;  %v2733_v42 = vld [vmem:[%s4516_s9 + $0x350] sm:$0xff]  ;;  %v2282_v45 = vld [vmem:[%s4518_s11 + $0xf8] sm:$0xff] }
 0x57a   : > { %2101 = vmatprep.subr.mxu0 %v2732_v47  ;;  %1833 = vmatpush1.msra.mxu1 %v2681_v48  ;;  %v2729_v44 = vld [vmem:[%s4516_s9 + $0x330] sm:$0xff]  ;;  %v2266_v46 = vld [vmem:[%s4518_s11 + $0x78] sm:$0xff] }
 0x57b   : > { %2102 = vmatpush1.msra.mxu0 %v2731_v49  ;;  %1834 = vmatprep.subr.mxu1 %v2678_v51  ;;  %v2281_v47 = vld [vmem:[%s4518_s11 + $0xf0] sm:$0xff]  ;;  %v2726_v48 = vld [vmem:[%s4516_s9 + $0x318] sm:$0xff] }
 0x57c   : > { %2103 = vmatprep.subr.mxu0 %v2728_v52  ;;  %1835 = vmatpush1.msra.mxu1 %v2677_v53  ;;  %v2265_v49 = vld [vmem:[%s4518_s11 + $0x70] sm:$0xff]  ;;  %v2280_v52 = vld [vmem:[%s4518_s11 + $0xe8] sm:$0xff] }
 0x57d   : > { %2104 = vmatpush1.msra.mxu0 %v2727_v54  ;;  %1836 = vmatprep.subr.mxu1 %v2674_v55  ;;  %v2725_v51 = vld [vmem:[%s4516_s9 + $0x310] sm:$0xff]  ;;  %v2264_v53 = vld [vmem:[%s4518_s11 + $0x68] sm:$0xff]  ;;  %v2279_v54 = vld [vmem:[%s4518_s11 + $0xe0] sm:$0xff] }
 0x57e   : > { %2105 = vmatprep.subr.mxu0 %v2724_v56  ;;  %1837 = vmatpush1.msra.mxu1 %v2673_v57  ;;  %v2263_v55 = vld [vmem:[%s4518_s11 + $0x60] sm:$0xff]  ;;  %v2278_v56 = vld [vmem:[%s4518_s11 + $0xd8] sm:$0xff] }
 0x57f   : > { %1870 = vmatprep.mubr.f32.mxu1 %v2953_v50  ;;  %2106 = vmatpush1.msra.mxu0 %v2723_v58  ;;  %v2262_v57 = vld [vmem:[%s4518_s11 + $0x58] sm:$0xff]  ;;  %v2277_v58 = vld [vmem:[%s4518_s11 + $0xd0] sm:$0xff] }
 0x580   : > { %2139 = vmatprep.mubr.f32.mxu0 %v2953_v50  ;;  %2720 = vmatmul.mubr.msk.f32.vlgmr.msra.gmra.mxu1 %vm495_vm0, %v3959_v13  ;;  %v1653_v13 = vld [vmem:[%s4516_s9 + $0x98] sm:$0xff] }
 0x581   : > { %1959 = vmatprep.subr.mxu1 %v1681_v59  ;;  %2771 = vmatmul.mubr.msk.f32.vlgmr.msra.gmra.mxu0 %vm495_vm0, %v4109_v63  ;;  %v2261_v59 = vld [vmem:[%s4518_s11 + $0x50] sm:$0xff] }
 0x582   : > { %1960 = vmatpush1.msra.mxu1 %v1680_v60  ;;  %2015 = vmatprep.mubr.f32.mxu1 %v2953_v50  ;;  %v2276_v60 = vld [vmem:[%s4518_s11 + $0xc8] sm:$0xff] }
 0x583   : > { %1961 = vmatprep.subr.mxu1 %v1677_v61  ;;  %2778 = vmatprep.subr.mxu0 %v2282_v45  ;;  %v2260_v61 = vld [vmem:[%s4518_s11 + $0x48] sm:$0xff] }
 0x584   : > { %1962 = vmatpush1.msra.mxu1 %v1676_v0  ;;  %2779 = vmatpush3.msra.mxu0 %v2266_v46  ;;  %v2259_v0 = vld [vmem:[%s4518_s11 + $0x40] sm:$0xff]  ;;  %v2300_v45 = vld [vmem:[%s4518_s11 + $0x188] sm:$0xff] }
 0x585   : > { %1963 = vmatprep.subr.mxu1 %v1673_v1  ;;  %2780 = vmatprep.subr.mxu0 %v2281_v47  ;;  %v2274_v1 = vld [vmem:[%s4518_s11 + $0xb8] sm:$0xff]  ;;  %v2299_v46 = vld [vmem:[%s4518_s11 + $0x180] sm:$0xff] }
 0x586   : > { %1964 = vmatpush1.msra.mxu1 %v1672_v3  ;;  %2781 = vmatpush3.msra.mxu0 %v2265_v49  ;;  %v2258_v3 = vld [vmem:[%s4518_s11 + $0x38] sm:$0xff]  ;;  %v2221_v49 = vld [vmem:[%s4517_s10] sm:$0xf] }
 0x587   : > { %1965 = vmatprep.subr.mxu1 %v1669_v4  ;;  %2782 = vmatprep.subr.mxu0 %v2280_v52  ;;  %v2273_v4 = vld [vmem:[%s4518_s11 + $0xb0] sm:$0xff] }
 0x588   : > { %1966 = vmatpush1.msra.mxu1 %v1668_v5  ;;  %2783 = vmatpush3.msra.mxu0 %v2264_v53  ;;  %v2257_v5 = vld [vmem:[%s4518_s11 + $0x30] sm:$0xff] }
 0x589   : > { %1967 = vmatprep.subr.mxu1 %v1665_v6  ;;  %2784 = vmatprep.subr.mxu0 %v2279_v54  ;;  %v2272_v6 = vld [vmem:[%s4518_s11 + $0xa8] sm:$0xff] }
 0x58a   : > { %1968 = vmatpush1.msra.mxu1 %v1664_v8  ;;  %2785 = vmatpush3.msra.mxu0 %v2263_v55  ;;  %v2256_v8 = vld [vmem:[%s4518_s11 + $0x28] sm:$0xff]  ;;  %v2226_v55 = vrot.slane %v2221_v49, %v3426_v2  ;;  %v2237_v2 = vsub.s32 3, %v3423_v62 }
 0x58b   : > { %1969 = vmatprep.subr.mxu1 %v1661_v9  ;;  %2786 = vmatprep.subr.mxu0 %v2278_v56  ;;  %v2271_v9 = vld [vmem:[%s4518_s11 + $0xa0] sm:$0xff] }
 0x58c   : > { %1970 = vmatpush1.msra.mxu1 %v1660_v10  ;;  %2787 = vmatpush3.msra.mxu0 %v2262_v57  ;;  %v2298_v10 = vld [vmem:[%s4518_s11 + $0x178] sm:$0xff] }
 0x58d   : > { %1971 = vmatprep.subr.mxu1 %v1657_v11  ;;  %2788 = vmatprep.subr.mxu0 %v2277_v58  ;;  %v2255_v11 = vld [vmem:[%s4518_s11 + $0x20] sm:$0xff]  ;;  %v2230_v58 = vrot.slane %v2221_v49, %v3432_v7 }
 0x58e   : > { %1972 = vmatpush1.msra.mxu1 %v1656_v12  ;;  %2789 = vmatpush3.msra.mxu0 %v2261_v59  ;;  %v2297_v12 = vld [vmem:[%s4518_s11 + $0x170] sm:$0xff] }
 0x58f   : > { %1973 = vmatprep.subr.mxu1 %v1653_v13  ;;  %2790 = vmatprep.subr.mxu0 %v2276_v60  ;;  %v2270_v13 = vld [vmem:[%s4518_s11 + $0x98] sm:$0xff] }
 0x590   : > { %1974 = vmatpush1.msra.mxu1 %v1652_v15  ;;  %2791 = vmatpush3.msra.mxu0 %v2260_v61  ;;  %v2296_v15 = vld [vmem:[%s4518_s11 + $0x168] sm:$0xff] }
 0x591   : > { %1975 = vmatprep.subr.mxu1 %v1649_v16  ;;  %v2254_v16 = vld [vmem:[%s4518_s11 + $0x18] sm:$0xff] }
 0x592   : > { %1976 = vmatpush1.msra.mxu1 %v1648_v17  ;;  %v2269_v17 = vld [vmem:[%s4518_s11 + $0x90] sm:$0xff] }
 0x593   : > { %1977 = vmatprep.subr.mxu1 %v1645_v18  ;;  %v2253_v18 = vld [vmem:[%s4518_s11 + $0x10] sm:$0xff] }
 0x594   : > { %1978 = vmatpush1.msra.mxu1 %v1644_v19  ;;  %v2268_v19 = vld [vmem:[%s4518_s11 + $0x88] sm:$0xff] }
 0x595   : > { %1979 = vmatprep.subr.mxu1 %v1641_v20  ;;  %v2252_v20 = vld [vmem:[%s4518_s11 + $0x8] sm:$0xff] }
 0x596   : > { %1980 = vmatpush1.msra.mxu1 %v1640_v21  ;;  %v2267_v21 = vld [vmem:[%s4518_s11 + $0x80] sm:$0xff] }
 0x597   : > { %1981 = vmatprep.subr.mxu1 %v1637_v22  ;;  %v2251_v22 = vld [vmem:[%s4518_s11] sm:$0xff] }
 0x598   : > { %1982 = vmatpush1.msra.mxu1 %v1636_v23  ;;  %v2295_v23 = vld [vmem:[%s4518_s11 + $0x160] sm:$0xff] }
 0x599   : > { %2722 = vmatmul.mubr.msk.f32.vlgmr.msra.gmra.mxu1 %vm495_vm0, %v3961_v14  ;;  %2154 = vmatprep.subr.mxu1 %v2770_v24  ;;  %v2758_v14 = vld [vmem:[%s4516_s9 + $0x418] sm:$0xff] }
 0x59a   : > { %2155 = vmatpush1.msra.mxu1 %v2769_v25  ;;  %2210 = vmatprep.mubr.f32.mxu1 %v2953_v50  ;;  %v2294_v24 = vld [vmem:[%s4518_s11 + $0x158] sm:$0xff]  ;;  %v2293_v25 = vld [vmem:[%s4518_s11 + $0x150] sm:$0xff] }
 0x59b   : > { %2156 = vmatprep.subr.mxu1 %v2766_v26  ;;  %v2292_v26 = vld [vmem:[%s4518_s11 + $0x148] sm:$0xff] }
 0x59c   : > { %2157 = vmatpush1.msra.mxu1 %v2765_v27  ;;  %v2291_v27 = vld [vmem:[%s4518_s11 + $0x140] sm:$0xff] }
 0x59d   : > { %2158 = vmatprep.subr.mxu1 %v2762_v28  ;;  %v2290_v28 = vld [vmem:[%s4518_s11 + $0x138] sm:$0xff] }
 0x59e   : > { %2159 = vmatpush1.msra.mxu1 %v2761_v29  ;;  %v2289_v29 = vld [vmem:[%s4518_s11 + $0x130] sm:$0xff] }
 0x59f   : > { %2160 = vmatprep.subr.mxu1 %v2758_v14  ;;  %v2288_v14 = vld [vmem:[%s4518_s11 + $0x128] sm:$0xff] }
 0x5a0   : > { %2161 = vmatpush1.msra.mxu1 %v2757_v30  ;;  %v2287_v30 = vld [vmem:[%s4518_s11 + $0x120] sm:$0xff] }
 0x5a1   : > { %2162 = vmatprep.subr.mxu1 %v2754_v31  ;;  %v2286_v31 = vld [vmem:[%s4518_s11 + $0x118] sm:$0xff] }
 0x5a2   : > { %2163 = vmatpush1.msra.mxu1 %v2753_v32  ;;  %v2285_v32 = vld [vmem:[%s4518_s11 + $0x110] sm:$0xff] }
 0x5a3   : > { %2164 = vmatprep.subr.mxu1 %v2750_v33  ;;  %v2284_v33 = vld [vmem:[%s4518_s11 + $0x108] sm:$0xff] }
 0x5a4   : > { %2165 = vmatpush1.msra.mxu1 %v2749_v34  ;;  %v2283_v34 = vld [vmem:[%s4518_s11 + $0x100] sm:$0xff] }
 0x5a5   : > { %2166 = vmatprep.subr.mxu1 %v2746_v35  ;;  %v2310_v35 = vld [vmem:[%s4518_s11 + $0x1d8] sm:$0xff] }
 0x5a6   : > { %2167 = vmatpush1.msra.mxu1 %v2745_v36  ;;  %v2309_v36 = vld [vmem:[%s4518_s11 + $0x1d0] sm:$0xff] }
 0x5a7   : > { %2168 = vmatprep.subr.mxu1 %v2742_v37  ;;  %v2308_v37 = vld [vmem:[%s4518_s11 + $0x1c8] sm:$0xff] }
 0x5a8   : > { %2169 = vmatpush1.msra.mxu1 %v2741_v38  ;;  %v2307_v38 = vld [vmem:[%s4518_s11 + $0x1c0] sm:$0xff] }
 0x5a9   : > { %2170 = vmatprep.subr.mxu1 %v2738_v39  ;;  %v2306_v39 = vld [vmem:[%s4518_s11 + $0x1b8] sm:$0xff] }
 0x5aa   : > { %2171 = vmatpush1.msra.mxu1 %v2737_v40  ;;  %v2305_v40 = vld [vmem:[%s4518_s11 + $0x1b0] sm:$0xff] }
 0x5ab   : > { %2172 = vmatprep.subr.mxu1 %v2734_v41  ;;  %v2304_v41 = vld [vmem:[%s4518_s11 + $0x1a8] sm:$0xff] }
 0x5ac   : > { %2173 = vmatpush1.msra.mxu1 %v2733_v42  ;;  %v2303_v42 = vld [vmem:[%s4518_s11 + $0x1a0] sm:$0xff] }
 0x5ad   : > { %2174 = vmatprep.subr.mxu1 %v2730_v43  ;;  %v2302_v43 = vld [vmem:[%s4518_s11 + $0x198] sm:$0xff] }
 0x5ae   : > { %2175 = vmatpush1.msra.mxu1 %v2729_v44  ;;  %v2301_v44 = vld [vmem:[%s4518_s11 + $0x190] sm:$0xff] }
 0x5af   : > { %2176 = vmatprep.subr.mxu1 %v2726_v48 }
 0x5b0   : > { %2177 = vmatpush1.msra.mxu1 %v2725_v51 }
 0x5b1   : > { %2772 = vmatmul.mubr.msk.f32.vlgmr.msra.gmra.mxu1 %vm495_vm0, %v4109_v63  ;;  %2384 = vmatprep.subr.mxu1 %v2953_v50  ;;  %v2275_v63 = vld [vmem:[%s4518_s11 + $0xc0] sm:$0xff] }
 0x5b2   : > { %2792 = vmatprep.subr.mxu0 %v2275_v63  ;;  %2385 = vmatpush1.msra.mxu1 %v2298_v10 }
 0x5b3   : > { %2793 = vmatpush3.msra.mxu0 %v2259_v0  ;;  %2386 = vmatprep.subr.mxu1 %v2953_v50 }
 0x5b4   : > { %2794 = vmatprep.subr.mxu0 %v2274_v1  ;;  %2387 = vmatpush1.msra.mxu1 %v2297_v12  ;;  %v2238_v12 = vrot.slane %v2221_v49, %v2237_v2 }
 0x5b5   : > { %2795 = vmatpush3.msra.mxu0 %v2258_v3  ;;  %2388 = vmatprep.subr.mxu1 %v2953_v50 }
 0x5b6   : > { %2796 = vmatprep.subr.mxu0 %v2273_v4  ;;  %2389 = vmatpush1.msra.mxu1 %v2296_v15 }
 0x5b7   : > { %2797 = vmatpush3.msra.mxu0 %v2257_v5  ;;  %2390 = vmatprep.subr.mxu1 %v2953_v50  ;;  %v2233_v5 = vsub.s32 2, %v3423_v62 }
 0x5b8   : > { %2798 = vmatprep.subr.mxu0 %v2272_v6  ;;  %2391 = vmatpush1.msra.mxu1 %v2295_v23 }
 0x5b9   : > { %2799 = vmatpush3.msra.mxu0 %v2256_v8  ;;  %2392 = vmatprep.subr.mxu1 %v2953_v50 }
 0x5ba   : > { %2800 = vmatprep.subr.mxu0 %v2271_v9  ;;  %2393 = vmatpush1.msra.mxu1 %v2294_v24  ;;  %v2234_v9 = vrot.slane %v2221_v49, %v2233_v5 }
 0x5bb   : > { %2801 = vmatpush3.msra.mxu0 %v2255_v11  ;;  %2394 = vmatprep.subr.mxu1 %v2953_v50 }
 0x5bc   : > { %2802 = vmatprep.subr.mxu0 %v2270_v13  ;;  %2395 = vmatpush1.msra.mxu1 %v2293_v25 }
 0x5bd   : > { %2803 = vmatpush3.msra.mxu0 %v2254_v16  ;;  %2396 = vmatprep.subr.mxu1 %v2953_v50 }
 0x5be   : > { %2804 = vmatprep.subr.mxu0 %v2269_v17  ;;  %2397 = vmatpush1.msra.mxu1 %v2292_v26 }
 0x5bf   : > { %2805 = vmatpush3.msra.mxu0 %v2253_v18  ;;  %2398 = vmatprep.subr.mxu1 %v2953_v50 }
 0x5c0   : > { %2806 = vmatprep.subr.mxu0 %v2268_v19  ;;  %2399 = vmatpush1.msra.mxu1 %v2291_v27 }
 0x5c1   : > { %2807 = vmatpush3.msra.mxu0 %v2252_v20  ;;  %2400 = vmatprep.subr.mxu1 %v2953_v50 }
 0x5c2   : > { %2808 = vmatprep.subr.mxu0 %v2267_v21  ;;  %2401 = vmatpush1.msra.mxu1 %v2290_v28 }
 0x5c3   : > { %2809 = vmatpush3.msra.mxu0 %v2251_v22  ;;  %2402 = vmatprep.subr.mxu1 %v2953_v50 }
 0x5c4   : > { %2403 = vmatpush1.msra.mxu1 %v2289_v29 }
 0x5c5   : > { %2404 = vmatprep.subr.mxu1 %v2953_v50 }
 0x5c6   : > { %2405 = vmatpush1.msra.mxu1 %v2288_v14 }
 0x5c7   : > { %2406 = vmatprep.subr.mxu1 %v2953_v50 }
 0x5c8   : > { %2407 = vmatpush1.msra.mxu1 %v2287_v30  ;;  %v2462_v30 = vld [vmem:[%s4519_s12] sm:$0x1] }
 0x5c9   : > { %2408 = vmatprep.subr.mxu1 %v2953_v50 }
 0x5ca   : > { %2409 = vmatpush1.msra.mxu1 %v2286_v31 }
 0x5cb   : > { %2410 = vmatprep.subr.mxu1 %v2953_v50 }
 0x5cc   : > { %2411 = vmatpush1.msra.mxu1 %v2285_v32 }
 0x5cd   : > { %2412 = vmatprep.subr.mxu1 %v2953_v50 }
 0x5ce   : > { %2413 = vmatpush1.msra.mxu1 %v2284_v33 }
 0x5cf   : > { %2414 = vmatprep.subr.mxu1 %v2953_v50 }
 0x5d0   : > { %2415 = vmatpush1.msra.mxu1 %v2283_v34 }
 0x5d1   : > { %2424 = vmatprep.subr.mxu1 %v2953_v50 }
 0x5d2   : > { %2425 = vmatpush2.msra.mxu1 %v2310_v35 }
 0x5d3   : > { %2426 = vmatprep.subr.mxu1 %v2953_v50 }
 0x5d4   : > { %2427 = vmatpush2.msra.mxu1 %v2309_v36 }
 0x5d5   : > { %2428 = vmatprep.subr.mxu1 %v2953_v50 }
 0x5d6   : > { %2429 = vmatpush2.msra.mxu1 %v2308_v37 }
 0x5d7   : > { %2430 = vmatprep.subr.mxu1 %v2953_v50 }
 0x5d8   : > { %2431 = vmatpush2.msra.mxu1 %v2307_v38 }
 0x5d9   : > { %2432 = vmatprep.subr.mxu1 %v2953_v50 }
 0x5da   : > { %2433 = vmatpush2.msra.mxu1 %v2306_v39 }
 0x5db   : > { %2434 = vmatprep.subr.mxu1 %v2953_v50 }
 0x5dc   : > { %2435 = vmatpush2.msra.mxu1 %v2305_v40 }
 0x5dd   : > { %2436 = vmatprep.subr.mxu1 %v2953_v50 }
 0x5de   : > { %2437 = vmatpush2.msra.mxu1 %v2304_v41 }
 0x5df   : > { %2438 = vmatprep.subr.mxu1 %v2953_v50 }
 0x5e0   : > { %2439 = vmatpush2.msra.mxu1 %v2303_v42 }
 0x5e1   : > { %2440 = vmatprep.subr.mxu1 %v2953_v50 }
 0x5e2   : > { %2441 = vmatpush2.msra.mxu1 %v2302_v43 }
 0x5e3   : > { %2442 = vmatprep.subr.mxu1 %v2953_v50 }
 0x5e4   : > { %2443 = vmatpush2.msra.mxu1 %v2301_v44 }
 0x5e5   : > { %2444 = vmatprep.subr.mxu1 %v2953_v50 }
 0x5e6   : > { %2445 = vmatpush2.msra.mxu1 %v2300_v45 }
 0x5e7   : > { %2446 = vmatprep.subr.mxu1 %v2953_v50 }
 0x5e8   : > { %2447 = vmatpush2.msra.mxu1 %v2299_v46 }
 0x627   : > { %v1801_v47 = vpop.f32.mrf.mxu1 }
 0x628   : > { %v1946_v48 = vpop.f32.mrf.mxu0 }
 0x629   : > { %v1803_v51 = vpop.f32.mrf.mxu1  ;;  %v1947_v53 = vadd.f32 %v1946_v48, %v1801_v47 }
 0x62a   : > { %v1948_v52 = vpop.f32.mrf.mxu0 }
 0x62b   : > { %v1949_v56 = vadd.f32 %v1948_v52, %v1803_v51 }
 0x640   : > { %v1872_v1 = vpop.f32.mrf.mxu1 }
 0x641   : > { %v2141_v54 = vpop.f32.mrf.mxu0 }
 0x642   : > { %v2217_v57 = vadd.f32 %v2141_v54, %v1947_v53  ;;  %v1874_v3 = vpop.f32.mrf.mxu1 }
 0x643   : > { %v2143_v59 = vpop.f32.mrf.mxu0 }
 0x644   : > { %v2218_v60 = vadd.f32 %v2143_v59, %v1949_v56  ;;  %v2243_v50 = vadd.f32 %v2226_v55, %v2217_v57 }
 0x646   : > { %v2244_v61 = vadd.f32 %v2230_v58, %v2218_v60 }
 0x648   : > { %2883 = vtanh.f32 %v2244_v61 }
 0x649   : > { %2885 = vtanh.f32 %v2243_v50 }
 0x655   : > { %v2884_v63 = vpop.eup %2883 }
 0x656   : > { %v2886_v0 = vpop.eup %2885  ;;  %2378 = vmatprep.mubr.f32.mxu0 %v2884_v63 }
 0x657   : > { %2379 = vmatmul.mubr.f32.vlgmr.msra.gmra.mxu0 %v2886_v0 }
 0x659   : > { %v2017_v4 = vpop.f32.mrf.mxu1 }
 0x65a   : > { %v2018_v8 = vadd.f32 %v2017_v4, %v1872_v1 }
 0x65b   : > { %v2019_v6 = vpop.f32.mrf.mxu1 }
 0x65c   : > { %v2020_v10 = vadd.f32 %v2019_v6, %v1874_v3 }
 0x671   : > { %v2212_v7 = vpop.f32.mrf.mxu1 }
 0x672   : > { %v2219_v11 = vadd.f32 %v2212_v7, %v2018_v8 }
 0x673   : > { %v2214_v13 = vpop.f32.mrf.mxu1 }
 0x674   : > { %v2220_v15 = vadd.f32 %v2214_v13, %v2020_v10  ;;  %v2245_v16 = vadd.f32 %v2234_v9, %v2219_v11 }
 0x676   : > { %v2246_v17 = vadd.f32 %v2238_v12, %v2220_v15 }
 0x678   : > { %2887 = vtanh.f32 %v2246_v17 }
 0x679   : > { %2889 = vtanh.f32 %v2245_v16 }
 0x685   : > { %v2888_v18 = vpop.eup %2887 }
 0x686   : > { %v2890_v19 = vpop.eup %2889  ;;  %2773 = vmatprep.mubr.msk.f32.mxu1 %vm495_vm0, %v2888_v18 }
 0x687   : > { %2449 = vmatmul.mubr.f32.vlgmr.msra.gmra.mxu1 %v2890_v19 }
 0x717   : > { %v2810_v62 = vpop.f32.mrf.mxu0 }
 0x719   : > { %v2811_v20 = vpop.f32.mrf.mxu0 }
 0x71a   : > { %v2812_v21 = vadd.f32 %v2811_v20, %v2810_v62 }
 0x747   : > { %v2450_v22 = vpop.f32.mrf.mxu1 }
 0x748   : > { %v2451_v23 = vadd.f32 %v2812_v21, %v2450_v22 }
 0x749   : > { %v2452_v24 = vpop.f32.mrf.mxu1 }
 0x74a   : > { %v2455_v25 = vsel %vm2454_vm12, %v2451_v23, 0.0 }
 0x74b   : > { %v2456_v26 = vrot.slane %v2455_v25, 4 }
 0x74d   : > { %v2457_v27 = vadd.f32 %v2456_v26, %v2455_v25 }
 0x74f   : > { %v2458_v28 = vrot.slane %v2457_v27, 2 }
 0x751   : > { %v2459_v29 = vadd.f32 %v2458_v28, %v2457_v27 }
 0x753   : > { %v2460_v14 = vrot.slane %v2459_v29, 1 }
 0x755   : > { %v2461_v31 = vadd.f32 %v2460_v14, %v2459_v29 }
 0x757   : > { %v2463_v32 = vadd.f32 %v2462_v30, %v2461_v31 }
 0x759   : > { %2465 = vst.msk [vmem:[%s432_s19] sm:$0x1] %vm2464_vm13, %v2463_v32 }
 0x75a   : > { %2904 = shalt.err (!%p2901_p3)
}
 0x75b   : > { %s2905_s16 = scalar_lea.hbm %s2477_s20, 16  ;;  %s2909_s19 = scalar_lea.hbm %s4520_s13, 32 }
 0x75c   : > { %p2906_p4 = scmp.ne.s32.totalorder %s2477_s20, %s2905_s16  ;;  %p2910_p9 = scmp.lt.s32.totalorder %s2477_s20, %s4520_s13 }
 0x75d   : > { %p2911_p10 = scmp.lt.s32.totalorder %s2909_s19, %s2905_s16 }
 0x75e   : > { %p2907_p7 = pnand %p2906_p4, %p3063_p5 }
 0x75f   : > { %p2912_p11 = por %p2911_p10, %p2910_p9 }
 0x760   : > { %p2908_p8 = pneg %p2907_p7 }
 0x762   : > { %p2913_p12 = pnand %p2912_p11, %p2908_p8 }
 0x764   : > { %2916 = shalt.err (!%p2913_p12)
}
 0x765   : > { %2813 = dma.vmem_to_hbm [thread:$0]  (%p3063_p5), %s2480_s17, 16, %s2477_s20, %s2467_s22  }
 0x766 PF: > { %p2819_p13 = scmp.ge.s32.totalorder %s2951_s28, 2  ;;  %s2491_s23 = sand.u32 1, %s2939_s25  }
 0x767   : > { %s2492_s15 = scalar_lea.sflag [#allocation5], %s2491_s23 }
 0x768   : > { %p2816_p0 = pnand %p2819_p13, %p3067_p6 }
 0x76a   : > { %p2817_p1 = pneg %p2816_p0 }
 0x76c   : > { %2934 = dma.done.wait (%p2817_p1), %s2492_s15, 16  }
 0x76d   : > { %2936 = vsyncadd (%p2817_p1), %s2492_s15, 4294967280  ;;  %s4532_s28 = sld [smem:[#allocation8_spill]]  ;;  %s4535_s25 = smov %s2943_s26 }
 0x76e   : > { %s4533_s29 = sld [smem:[#allocation7_spill]] }
 0x76f   : > { %s4534_s27 = sld [smem:[#allocation9_spill]] }
 0x773   : > { %p23_p2 = scmp.ge.s32.totalorder %s4532_s28, 4  }
 0x774   : > { %s4536_s26 = smov %s4533_s29 }
 0x775   :  { %25 = sbr.rel (!%p23_p2) target bundleno = 3 (0x3), region = 113 }
 0x77a   :  { %2496 = vsyncpa [#allocation5], 1 }
 0x77b   :  { %2498 = vsyncpa [#allocation5 + $0x1], 1 }

</bundles_post_ra>
